<compile_context>
chip_gen: v7x
topology: tpu7x:2x2x1
jax: 0.10.0
libtpu: 0.0.40
codegen_flags: <defaults>
</compile_context>

<pallas_src>
import functools
import math

import jax
import jax.numpy as jnp
from jax.experimental import pallas as pl
from jax.experimental.pallas import tpu as pltpu

# ----------------------------------------------------------------------------
# Scaled-down ViT-B/16 configuration (same structure, small dims).
# Real ViT-B/16: img=224, hidden=768, heads=12, mlp=3072, layers=12, classes=100.
# ----------------------------------------------------------------------------
PATCH = 16
IMG = 32                 # -> (32/16)^2 = 4 patches, seq = 5 (cls + patches)
IN_CH = 3
HIDDEN = 128
NUM_HEADS = 4            # head_dim = 32
HEAD_DIM = HIDDEN // NUM_HEADS
MLP_DIM = 256
NUM_LAYERS = 2
NUM_CLASSES = 100
NUM_CLASSES_PAD = 128    # lane-dense classifier output; sliced to 100 in wrapper
LN_EPS = 1e-6            # torchvision ViT uses LayerNorm(eps=1e-6)
MXU_DT = jnp.bfloat16    # matmul-operand dtype (f32 accumulate); elementwise stays f32

LAYER_KEYS = ("ln1_w", "ln1_b", "qkv_w", "qkv_b", "out_w", "out_b",
              "ln2_w", "ln2_b", "fc1_w", "fc1_b", "fc2_w", "fc2_b")


def _layernorm(h, w, b):
    # One-pass statistics: var = E[x^2] - mu^2 (halves XLU cross-lane reductions).
    mu = jnp.mean(h, axis=-1, keepdims=True)
    msq = jnp.mean(h * h, axis=-1, keepdims=True)
    var = msq - mu * mu
    return (h - mu) * jax.lax.rsqrt(var + LN_EPS) * w + b


def _gelu(x):
    # TODO(synk): PyTorch nn.GELU() default is the exact erf-GELU; tanh
    # approximation used for guaranteed Mosaic lowering (~1e-3 rel. difference).
    c = 0.7978845608028654  # sqrt(2/pi)
    return 0.5 * x * (1.0 + jnp.tanh(c * (x + 0.044715 * x * x * x)))


# ----------------------------------------------------------------------------
# Single fused kernel: patch-embed -> +cls/pos -> N encoder blocks -> LN -> head
# Grid axis 0 = batch (one image per grid step / per TensorCore on v7x).
# ----------------------------------------------------------------------------
def _vit_fused_kernel(*refs, num_layers, num_heads):
    p_ref, convw_ref, convb_ref, cls_ref, pos_ref = refs[:5]
    layer_refs = refs[5:5 + 12 * num_layers]
    lnfw_ref, lnfb_ref, headw_ref, headb_ref = refs[5 + 12 * num_layers:
                                                    9 + 12 * num_layers]
    o_ref = refs[-1]

    # ---- patch embedding (stride-16 conv == per-patch matmul) + bias ----
    patches = p_ref[0].astype(MXU_DT)                                  # (nP, C*P*P)
    tok = jnp.dot(patches, convw_ref[...],
                  preferred_element_type=jnp.float32) + convb_ref[...]  # (nP, D)
    x = jnp.concatenate([cls_ref[...], tok], axis=0) + pos_ref[...]     # (S, D)
    # encoder dropout: p=0.0 and eval mode -> identity

    D = x.shape[-1]
    hd = D // num_heads
    scale = 1.0 / math.sqrt(hd)

    for L in range(num_layers):
        (ln1w, ln1b, qkvw, qkvb, ow, ob,
         ln2w, ln2b, f1w, f1b, f2w, f2b) = layer_refs[12 * L:12 * (L + 1)]

        # ---- pre-LN multi-head self-attention ----
        h = _layernorm(x, ln1w[...], ln1b[...])
        qkv = jnp.dot(h.astype(MXU_DT), qkvw[...],
                      preferred_element_type=jnp.float32) + qkvb[...]   # (S, 3D)
        q, k, v = qkv[:, :D], qkv[:, D:2 * D], qkv[:, 2 * D:]

        # Heads moved to a new *major* axis (cheap concat; no lane-dim relayout),
        # then one batched einsum pair + a single vectorized softmax for all heads.
        qh = jnp.stack([q[:, i * hd:(i + 1) * hd] for i in range(num_heads)])
        kh = jnp.stack([k[:, i * hd:(i + 1) * hd] for i in range(num_heads)])
        vh = jnp.stack([v[:, i * hd:(i + 1) * hd] for i in range(num_heads)])
        s = jnp.einsum("hqd,hkd->hqk", qh, kh,
                       preferred_element_type=jnp.float32) * scale      # (H, S, S)
        s = s - jnp.max(s, axis=-1, keepdims=True)
        e = jnp.exp(s)
        p = e * pl.reciprocal(jnp.sum(e, axis=-1, keepdims=True), approx=True)
        ah = jnp.einsum("hqk,hkd->hqd", p, vh,
                        preferred_element_type=jnp.float32)             # (H, S, hd)

        # Heads re-merged by summing per-head output projections (out_w stored
        # head-major as (H, hd, D)) -- avoids any minor-axis concatenate.
        attn = ob[...]                                                   # (1, D)
        for i in range(num_heads):
            attn = attn + jnp.dot(ah[i].astype(MXU_DT), ow[i],
                                  preferred_element_type=jnp.float32)
        x = x + attn                                                     # residual 1

        # ---- pre-LN MLP ----
        h2 = _layernorm(x, ln2w[...], ln2b[...])
        f = jnp.dot(h2.astype(MXU_DT), f1w[...],
                    preferred_element_type=jnp.float32) + f1b[...]
        f = _gelu(f)
        f = jnp.dot(f.astype(MXU_DT), f2w[...],
                    preferred_element_type=jnp.float32) + f2b[...]
        x = x + f                                                        # residual 2

    # ---- final LN (per-token, so cls-token-only is exact) + padded head ----
    cls_tok = x[0:1, :]                                                  # (1, D)
    hc = _layernorm(cls_tok, lnfw_ref[...], lnfb_ref[...])
    logits = jnp.dot(hc.astype(MXU_DT), headw_ref[...],
                     preferred_element_type=jnp.float32) + headb_ref[...]  # (1, 128)
    o_ref[...] = logits.reshape(o_ref.shape).astype(o_ref.dtype)


# ----------------------------------------------------------------------------
# Parameter init (deterministic, synthetic — NOT a checkpoint load)
# ----------------------------------------------------------------------------
def init_params(key):
    state = {"key": key}

    def rnd(shape, scale=0.02):
        state["key"], sub = jax.random.split(state["key"])
        return scale * jax.random.normal(sub, shape, dtype=jnp.float32)

    D, M = HIDDEN, MLP_DIM
    seq = (IMG // PATCH) ** 2 + 1

    # Classifier weight padded to 128 output lanes (columns 100..127 are zero).
    head_w = jnp.pad(rnd((D, NUM_CLASSES)),
                     ((0, 0), (0, NUM_CLASSES_PAD - NUM_CLASSES)))

    params = {
        # conv_proj weight (D, C, P, P) flattened & transposed -> (C*P*P, D)
        "conv_w": rnd((IN_CH * PATCH * PATCH, D)).astype(MXU_DT),
        "conv_b": jnp.zeros((1, D), jnp.float32),
        "cls": rnd((1, D)),
        "pos": rnd((seq, D)),
        "ln_f_w": jnp.ones((1, D), jnp.float32),
        "ln_f_b": jnp.zeros((1, D), jnp.float32),
        "head_w": head_w.astype(MXU_DT),
        "head_b": jnp.zeros((1, NUM_CLASSES_PAD), jnp.float32),
        "layers": [],
    }
    for _ in range(NUM_LAYERS):
        params["layers"].append({
            "ln1_w": jnp.ones((1, D), jnp.float32),
            "ln1_b": jnp.zeros((1, D), jnp.float32),
            "qkv_w": rnd((D, 3 * D)).astype(MXU_DT),
            "qkv_b": jnp.zeros((1, 3 * D), jnp.float32),
            # out_w stored head-major (H, hd, D): rows of the (D, D) matrix are
            # indexed by (head, head_dim), so this reshape is exact.
            "out_w": rnd((D, D)).reshape(NUM_HEADS, HEAD_DIM, D).astype(MXU_DT),
            "out_b": jnp.zeros((1, D), jnp.float32),
            "ln2_w": jnp.ones((1, D), jnp.float32),
            "ln2_b": jnp.zeros((1, D), jnp.float32),
            "fc1_w": rnd((D, M)).astype(MXU_DT),
            "fc1_b": jnp.zeros((1, M), jnp.float32),
            "fc2_w": rnd((M, D)).astype(MXU_DT),
            "fc2_b": jnp.zeros((1, D), jnp.float32),
        })
    return params


# ----------------------------------------------------------------------------
# Full forward pass: one pallas_call, batch-parallel grid.
# ----------------------------------------------------------------------------
def vit_forward(params, x):
    B, C, H, W = x.shape
    gh, gw = H // PATCH, W // PATCH
    n_patches = gh * gw
    cpp = C * PATCH * PATCH

    # Stride-16 / kernel-16 conv == non-overlapping patch extraction.
    # TODO(synk): at real 224x224 scale, fold this transpose into the kernel via a
    # patch-indexed BlockSpec index_map instead of a separate XLA HBM pass.
    p = x.reshape(B, C, gh, PATCH, gw, PATCH)
    p = p.transpose(0, 2, 4, 1, 3, 5).reshape(B, n_patches, cpp)

    flat_layers = [lp[k] for lp in params["layers"] for k in LAYER_KEYS]
    inputs = [p, params["conv_w"], params["conv_b"], params["cls"], params["pos"],
              *flat_layers,
              params["ln_f_w"], params["ln_f_b"],
              params["head_w"], params["head_b"]]

    def per_batch_spec(arr):
        nd = arr.ndim
        return pl.BlockSpec((1,) + arr.shape[1:],
                            lambda b, nd=nd: (b,) + (0,) * (nd - 1))

    def resident_spec(arr):
        # Full-array block with a constant index map: weights stay VMEM-resident
        # across the batch grid (no re-DMA between grid steps).
        nd = arr.ndim
        return pl.BlockSpec(arr.shape, lambda b, nd=nd: (0,) * nd)

    in_specs = [per_batch_spec(p)] + [resident_spec(a) for a in inputs[1:]]

    kern = functools.partial(_vit_fused_kernel,
                             num_layers=len(params["layers"]),
                             num_heads=NUM_HEADS)

    out = pl.pallas_call(
        kern,
        out_shape=jax.ShapeDtypeStruct((B, 1, NUM_CLASSES_PAD), jnp.float32),
        grid=(B,),
        in_specs=in_specs,
        out_specs=pl.BlockSpec((1, 1, NUM_CLASSES_PAD), lambda b: (b, 0, 0)),
        compiler_params=pltpu.CompilerParams(
            # batch axis is independent -> shards across the 2 TCs on v7x,
            # harmless single-TC loop on v5e/v6e.
            dimension_semantics=("parallel",),
        ),
    )(*inputs)

    return out.reshape(B, NUM_CLASSES_PAD)[:, :NUM_CLASSES]


if __name__ == "__main__":
    key = jax.random.PRNGKey(0)
    pkey, xkey = jax.random.split(key)
    params = init_params(pkey)
    x = jax.random.normal(xkey, (2, IN_CH, IMG, IMG), dtype=jnp.float32)

    fwd = jax.jit(vit_forward)
    out = jax.block_until_ready(fwd(params, x))

    assert out.shape == (2, NUM_CLASSES), out.shape
    assert bool(jnp.all(jnp.isfinite(out)))
    print("KERNEL_OK")
</pallas_src>

<mosaic_0001>
module attributes {stable_mosaic.version = 11 : i64} {
  func.func @_vit_fused_kernel(%arg0: i32, %arg1: memref<1x4x768xf32, #tpu.memory_space<vmem>>, %arg2: memref<768x128xbf16, #tpu.memory_space<vmem>>, %arg3: memref<1x128xf32, #tpu.memory_space<vmem>>, %arg4: memref<1x128xf32, #tpu.memory_space<vmem>>, %arg5: memref<5x128xf32, #tpu.memory_space<vmem>>, %arg6: memref<1x128xf32, #tpu.memory_space<vmem>>, %arg7: memref<1x128xf32, #tpu.memory_space<vmem>>, %arg8: memref<128x384xbf16, #tpu.memory_space<vmem>>, %arg9: memref<1x384xf32, #tpu.memory_space<vmem>>, %arg10: memref<4x32x128xbf16, #tpu.memory_space<vmem>>, %arg11: memref<1x128xf32, #tpu.memory_space<vmem>>, %arg12: memref<1x128xf32, #tpu.memory_space<vmem>>, %arg13: memref<1x128xf32, #tpu.memory_space<vmem>>, %arg14: memref<128x256xbf16, #tpu.memory_space<vmem>>, %arg15: memref<1x256xf32, #tpu.memory_space<vmem>>, %arg16: memref<256x128xbf16, #tpu.memory_space<vmem>>, %arg17: memref<1x128xf32, #tpu.memory_space<vmem>>, %arg18: memref<1x128xf32, #tpu.memory_space<vmem>>, %arg19: memref<1x128xf32, #tpu.memory_space<vmem>>, %arg20: memref<128x384xbf16, #tpu.memory_space<vmem>>, %arg21: memref<1x384xf32, #tpu.memory_space<vmem>>, %arg22: memref<4x32x128xbf16, #tpu.memory_space<vmem>>, %arg23: memref<1x128xf32, #tpu.memory_space<vmem>>, %arg24: memref<1x128xf32, #tpu.memory_space<vmem>>, %arg25: memref<1x128xf32, #tpu.memory_space<vmem>>, %arg26: memref<128x256xbf16, #tpu.memory_space<vmem>>, %arg27: memref<1x256xf32, #tpu.memory_space<vmem>>, %arg28: memref<256x128xbf16, #tpu.memory_space<vmem>>, %arg29: memref<1x128xf32, #tpu.memory_space<vmem>>, %arg30: memref<1x128xf32, #tpu.memory_space<vmem>>, %arg31: memref<1x128xf32, #tpu.memory_space<vmem>>, %arg32: memref<128x128xbf16, #tpu.memory_space<vmem>>, %arg33: memref<1x128xf32, #tpu.memory_space<vmem>>, %arg34: memref<1x1x128xf32, #tpu.memory_space<vmem>>) attributes {dimension_semantics = [#tpu.dimension_semantics<parallel>], iteration_bounds = array<i64: 2>, scalar_prefetch = 0 : i64, scratch_operands = 0 : i64, tpu.core_type = #tpu.core_type<tc>, window_params = [{transform_indices = @transform_0, window_bounds = array<i64: 1, 4, 768>}, {pipeline_mode = #tpu.pipeline_mode<synchronous>, transform_indices = @transform_1, window_bounds = array<i64: 768, 128>}, {pipeline_mode = #tpu.pipeline_mode<synchronous>, transform_indices = @transform_2, window_bounds = array<i64: 1, 128>}, {pipeline_mode = #tpu.pipeline_mode<synchronous>, transform_indices = @transform_3, window_bounds = array<i64: 1, 128>}, {pipeline_mode = #tpu.pipeline_mode<synchronous>, transform_indices = @transform_4, window_bounds = array<i64: 5, 128>}, {pipeline_mode = #tpu.pipeline_mode<synchronous>, transform_indices = @transform_5, window_bounds = array<i64: 1, 128>}, {pipeline_mode = #tpu.pipeline_mode<synchronous>, transform_indices = @transform_6, window_bounds = array<i64: 1, 128>}, {pipeline_mode = #tpu.pipeline_mode<synchronous>, transform_indices = @transform_7, window_bounds = array<i64: 128, 384>}, {pipeline_mode = #tpu.pipeline_mode<synchronous>, transform_indices = @transform_8, window_bounds = array<i64: 1, 384>}, {pipeline_mode = #tpu.pipeline_mode<synchronous>, transform_indices = @transform_9, window_bounds = array<i64: 4, 32, 128>}, {pipeline_mode = #tpu.pipeline_mode<synchronous>, transform_indices = @transform_10, window_bounds = array<i64: 1, 128>}, {pipeline_mode = #tpu.pipeline_mode<synchronous>, transform_indices = @transform_11, window_bounds = array<i64: 1, 128>}, {pipeline_mode = #tpu.pipeline_mode<synchronous>, transform_indices = @transform_12, window_bounds = array<i64: 1, 128>}, {pipeline_mode = #tpu.pipeline_mode<synchronous>, transform_indices = @transform_13, window_bounds = array<i64: 128, 256>}, {pipeline_mode = #tpu.pipeline_mode<synchronous>, transform_indices = @transform_14, window_bounds = array<i64: 1, 256>}, {pipeline_mode = #tpu.pipeline_mode<synchronous>, transform_indices = @transform_15, window_bounds = array<i64: 256, 128>}, {pipeline_mode = #tpu.pipeline_mode<synchronous>, transform_indices = @transform_16, window_bounds = array<i64: 1, 128>}, {pipeline_mode = #tpu.pipeline_mode<synchronous>, transform_indices = @transform_17, window_bounds = array<i64: 1, 128>}, {pipeline_mode = #tpu.pipeline_mode<synchronous>, transform_indices = @transform_18, window_bounds = array<i64: 1, 128>}, {pipeline_mode = #tpu.pipeline_mode<synchronous>, transform_indices = @transform_19, window_bounds = array<i64: 128, 384>}, {pipeline_mode = #tpu.pipeline_mode<synchronous>, transform_indices = @transform_20, window_bounds = array<i64: 1, 384>}, {pipeline_mode = #tpu.pipeline_mode<synchronous>, transform_indices = @transform_21, window_bounds = array<i64: 4, 32, 128>}, {pipeline_mode = #tpu.pipeline_mode<synchronous>, transform_indices = @transform_22, window_bounds = array<i64: 1, 128>}, {pipeline_mode = #tpu.pipeline_mode<synchronous>, transform_indices = @transform_23, window_bounds = array<i64: 1, 128>}, {pipeline_mode = #tpu.pipeline_mode<synchronous>, transform_indices = @transform_24, window_bounds = array<i64: 1, 128>}, {pipeline_mode = #tpu.pipeline_mode<synchronous>, transform_indices = @transform_25, window_bounds = array<i64: 128, 256>}, {pipeline_mode = #tpu.pipeline_mode<synchronous>, transform_indices = @transform_26, window_bounds = array<i64: 1, 256>}, {pipeline_mode = #tpu.pipeline_mode<synchronous>, transform_indices = @transform_27, window_bounds = array<i64: 256, 128>}, {pipeline_mode = #tpu.pipeline_mode<synchronous>, transform_indices = @transform_28, window_bounds = array<i64: 1, 128>}, {pipeline_mode = #tpu.pipeline_mode<synchronous>, transform_indices = @transform_29, window_bounds = array<i64: 1, 128>}, {pipeline_mode = #tpu.pipeline_mode<synchronous>, transform_indices = @transform_30, window_bounds = array<i64: 1, 128>}, {pipeline_mode = #tpu.pipeline_mode<synchronous>, transform_indices = @transform_31, window_bounds = array<i64: 128, 128>}, {pipeline_mode = #tpu.pipeline_mode<synchronous>, transform_indices = @transform_32, window_bounds = array<i64: 1, 128>}, {transform_indices = @transform_33, window_bounds = array<i64: 1, 1, 128>}]} {
    %c0 = arith.constant 0 : index
    %c0_0 = arith.constant 0 : index
    %c0_1 = arith.constant 0 : index
    %0 = vector.load %arg1[%c0, %c0_0, %c0_1] : memref<1x4x768xf32, #tpu.memory_space<vmem>>, vector<1x4x768xf32>
    %1 = vector.shape_cast %0 : vector<1x4x768xf32> to vector<4x768xf32>
    %2 = arith.truncf %1 : vector<4x768xf32> to vector<4x768xbf16>
    %c0_2 = arith.constant 0 : index
    %c0_3 = arith.constant 0 : index
    %3 = vector.load %arg2[%c0_2, %c0_3] : memref<768x128xbf16, #tpu.memory_space<vmem>>, vector<768x128xbf16>
    %cst = arith.constant dense<0.000000e+00> : vector<4x128xf32>
    %4 = tpu.matmul %2, %3, %cst {dimension_numbers = #tpu.dot_dimension_numbers<[1], [0], [0], [1], [0, 0, 1, 1], [], []>} : vector<4x768xbf16>, vector<768x128xbf16>, vector<4x128xf32> -> vector<4x128xf32>
    %c0_4 = arith.constant 0 : index
    %c0_5 = arith.constant 0 : index
    %5 = vector.load %arg3[%c0_4, %c0_5] : memref<1x128xf32, #tpu.memory_space<vmem>>, vector<1x128xf32>
    %6 = vector.broadcast %5 : vector<1x128xf32> to vector<4x128xf32>
    %7 = arith.addf %4, %6 : vector<4x128xf32>
    %c0_6 = arith.constant 0 : index
    %c0_7 = arith.constant 0 : index
    %8 = vector.load %arg4[%c0_6, %c0_7] : memref<1x128xf32, #tpu.memory_space<vmem>>, vector<1x128xf32>
    %9 = tpu.concatenate %8, %7 in 0 : vector<1x128xf32>, vector<4x128xf32> -> vector<5x128xf32>
    %c0_8 = arith.constant 0 : index
    %c0_9 = arith.constant 0 : index
    %10 = vector.load %arg5[%c0_8, %c0_9] : memref<5x128xf32, #tpu.memory_space<vmem>>, vector<5x128xf32>
    %11 = arith.addf %9, %10 : vector<5x128xf32>
    %c0_10 = arith.constant 0 : index
    %c0_11 = arith.constant 0 : index
    %12 = vector.load %arg6[%c0_10, %c0_11] : memref<1x128xf32, #tpu.memory_space<vmem>>, vector<1x128xf32>
    %c0_12 = arith.constant 0 : index
    %c0_13 = arith.constant 0 : index
    %13 = vector.load %arg7[%c0_12, %c0_13] : memref<1x128xf32, #tpu.memory_space<vmem>>, vector<1x128xf32>
    %cst_14 = arith.constant dense<0.000000e+00> : vector<5xf32>
    %14 = vector.multi_reduction <add>, %11, %cst_14 [1] : vector<5x128xf32> to vector<5xf32>
    %15 = vector.shape_cast %14 : vector<5xf32> to vector<5x1xf32>
    %cst_15 = arith.constant 1.280000e+02 : f32
    %16 = vector.broadcast %cst_15 : f32 to vector<5x1xf32>
    %17 = arith.divf %15, %16 : vector<5x1xf32>
    %18 = arith.mulf %11, %11 : vector<5x128xf32>
    %cst_16 = arith.constant dense<0.000000e+00> : vector<5xf32>
    %19 = vector.multi_reduction <add>, %18, %cst_16 [1] : vector<5x128xf32> to vector<5xf32>
    %20 = vector.shape_cast %19 : vector<5xf32> to vector<5x1xf32>
    %cst_17 = arith.constant 1.280000e+02 : f32
    %21 = vector.broadcast %cst_17 : f32 to vector<5x1xf32>
    %22 = arith.divf %20, %21 : vector<5x1xf32>
    %23 = arith.mulf %17, %17 : vector<5x1xf32>
    %24 = arith.subf %22, %23 : vector<5x1xf32>
    %25 = vector.broadcast %17 : vector<5x1xf32> to vector<5x128xf32>
    %26 = arith.subf %11, %25 : vector<5x128xf32>
    %cst_18 = arith.constant 9.99999997E-7 : f32
    %27 = vector.broadcast %cst_18 : f32 to vector<5x1xf32>
    %28 = arith.addf %24, %27 : vector<5x1xf32>
    %29 = math.rsqrt %28 : vector<5x1xf32>
    %30 = vector.broadcast %29 : vector<5x1xf32> to vector<5x128xf32>
    %31 = arith.mulf %26, %30 : vector<5x128xf32>
    %32 = vector.broadcast %12 : vector<1x128xf32> to vector<5x128xf32>
    %33 = arith.mulf %31, %32 : vector<5x128xf32>
    %34 = vector.broadcast %13 : vector<1x128xf32> to vector<5x128xf32>
    %35 = arith.addf %33, %34 : vector<5x128xf32>
    %36 = arith.truncf %35 : vector<5x128xf32> to vector<5x128xbf16>
    %c0_19 = arith.constant 0 : index
    %c0_20 = arith.constant 0 : index
    %37 = vector.load %arg8[%c0_19, %c0_20] : memref<128x384xbf16, #tpu.memory_space<vmem>>, vector<128x384xbf16>
    %cst_21 = arith.constant dense<0.000000e+00> : vector<5x384xf32>
    %38 = tpu.matmul %36, %37, %cst_21 {dimension_numbers = #tpu.dot_dimension_numbers<[1], [0], [0], [1], [0, 0, 1, 1], [], []>} : vector<5x128xbf16>, vector<128x384xbf16>, vector<5x384xf32> -> vector<5x384xf32>
    %c0_22 = arith.constant 0 : index
    %c0_23 = arith.constant 0 : index
    %39 = vector.load %arg9[%c0_22, %c0_23] : memref<1x384xf32, #tpu.memory_space<vmem>>, vector<1x384xf32>
    %40 = vector.broadcast %39 : vector<1x384xf32> to vector<5x384xf32>
    %41 = arith.addf %38, %40 : vector<5x384xf32>
    %42 = vector.extract_strided_slice %41 {offsets = [0, 0], sizes = [5, 128], strides = [1, 1]} : vector<5x384xf32> to vector<5x128xf32>
    %43 = vector.extract_strided_slice %41 {offsets = [0, 128], sizes = [5, 128], strides = [1, 1]} : vector<5x384xf32> to vector<5x128xf32>
    %44 = vector.extract_strided_slice %41 {offsets = [0, 256], sizes = [5, 128], strides = [1, 1]} : vector<5x384xf32> to vector<5x128xf32>
    %45 = vector.extract_strided_slice %42 {offsets = [0, 0], sizes = [5, 32], strides = [1, 1]} : vector<5x128xf32> to vector<5x32xf32>
    %46 = vector.extract_strided_slice %42 {offsets = [0, 32], sizes = [5, 32], strides = [1, 1]} : vector<5x128xf32> to vector<5x32xf32>
    %47 = vector.extract_strided_slice %42 {offsets = [0, 64], sizes = [5, 32], strides = [1, 1]} : vector<5x128xf32> to vector<5x32xf32>
    %48 = vector.extract_strided_slice %42 {offsets = [0, 96], sizes = [5, 32], strides = [1, 1]} : vector<5x128xf32> to vector<5x32xf32>
    %49 = vector.shape_cast %45 : vector<5x32xf32> to vector<1x5x32xf32>
    %50 = vector.shape_cast %46 : vector<5x32xf32> to vector<1x5x32xf32>
    %51 = vector.shape_cast %47 : vector<5x32xf32> to vector<1x5x32xf32>
    %52 = vector.shape_cast %48 : vector<5x32xf32> to vector<1x5x32xf32>
    %53 = tpu.concatenate %49, %50, %51, %52 in 0 : vector<1x5x32xf32>, vector<1x5x32xf32>, vector<1x5x32xf32>, vector<1x5x32xf32> -> vector<4x5x32xf32>
    %54 = vector.extract_strided_slice %43 {offsets = [0, 0], sizes = [5, 32], strides = [1, 1]} : vector<5x128xf32> to vector<5x32xf32>
    %55 = vector.extract_strided_slice %43 {offsets = [0, 32], sizes = [5, 32], strides = [1, 1]} : vector<5x128xf32> to vector<5x32xf32>
    %56 = vector.extract_strided_slice %43 {offsets = [0, 64], sizes = [5, 32], strides = [1, 1]} : vector<5x128xf32> to vector<5x32xf32>
    %57 = vector.extract_strided_slice %43 {offsets = [0, 96], sizes = [5, 32], strides = [1, 1]} : vector<5x128xf32> to vector<5x32xf32>
    %58 = vector.shape_cast %54 : vector<5x32xf32> to vector<1x5x32xf32>
    %59 = vector.shape_cast %55 : vector<5x32xf32> to vector<1x5x32xf32>
    %60 = vector.shape_cast %56 : vector<5x32xf32> to vector<1x5x32xf32>
    %61 = vector.shape_cast %57 : vector<5x32xf32> to vector<1x5x32xf32>
    %62 = tpu.concatenate %58, %59, %60, %61 in 0 : vector<1x5x32xf32>, vector<1x5x32xf32>, vector<1x5x32xf32>, vector<1x5x32xf32> -> vector<4x5x32xf32>
    %63 = vector.extract_strided_slice %44 {offsets = [0, 0], sizes = [5, 32], strides = [1, 1]} : vector<5x128xf32> to vector<5x32xf32>
    %64 = vector.extract_strided_slice %44 {offsets = [0, 32], sizes = [5, 32], strides = [1, 1]} : vector<5x128xf32> to vector<5x32xf32>
    %65 = vector.extract_strided_slice %44 {offsets = [0, 64], sizes = [5, 32], strides = [1, 1]} : vector<5x128xf32> to vector<5x32xf32>
    %66 = vector.extract_strided_slice %44 {offsets = [0, 96], sizes = [5, 32], strides = [1, 1]} : vector<5x128xf32> to vector<5x32xf32>
    %67 = vector.shape_cast %63 : vector<5x32xf32> to vector<1x5x32xf32>
    %68 = vector.shape_cast %64 : vector<5x32xf32> to vector<1x5x32xf32>
    %69 = vector.shape_cast %65 : vector<5x32xf32> to vector<1x5x32xf32>
    %70 = vector.shape_cast %66 : vector<5x32xf32> to vector<1x5x32xf32>
    %71 = tpu.concatenate %67, %68, %69, %70 in 0 : vector<1x5x32xf32>, vector<1x5x32xf32>, vector<1x5x32xf32>, vector<1x5x32xf32> -> vector<4x5x32xf32>
    "tpu.trace_start"() <{level = 10 : i32, message = "hqd,hkd->hqk"}> : () -> ()
    %cst_24 = arith.constant dense<0.000000e+00> : vector<4x5x5xf32>
    %72 = tpu.matmul %53, %62, %cst_24 {dimension_numbers = #tpu.dot_dimension_numbers<[2], [2], [1], [1], [0, 0, 0, 1, 1, 1], [0], [0]>} : vector<4x5x32xf32>, vector<4x5x32xf32>, vector<4x5x5xf32> -> vector<4x5x5xf32>
    "tpu.trace_stop"() : () -> ()
    %cst_25 = arith.constant 0.176776692 : f32
    %73 = vector.broadcast %cst_25 : f32 to vector<4x5x5xf32>
    %74 = arith.mulf %72, %73 : vector<4x5x5xf32>
    %cst_26 = arith.constant dense<0xFF800000> : vector<4x5xf32>
    %75 = vector.multi_reduction <maximumf>, %74, %cst_26 [2] : vector<4x5x5xf32> to vector<4x5xf32>
    %76 = vector.shape_cast %75 : vector<4x5xf32> to vector<4x5x1xf32>
    %77 = vector.broadcast %76 : vector<4x5x1xf32> to vector<4x5x5xf32>
    %78 = arith.subf %74, %77 : vector<4x5x5xf32>
    %79 = math.exp %78 : vector<4x5x5xf32>
    %cst_27 = arith.constant dense<0.000000e+00> : vector<4x5xf32>
    %80 = vector.multi_reduction <add>, %79, %cst_27 [2] : vector<4x5x5xf32> to vector<4x5xf32>
    %81 = vector.shape_cast %80 : vector<4x5xf32> to vector<4x5x1xf32>
    %82 = tpu.reciprocal %81 {approx = true} : vector<4x5x1xf32> -> vector<4x5x1xf32>
    %83 = vector.broadcast %82 : vector<4x5x1xf32> to vector<4x5x5xf32>
    %84 = arith.mulf %79, %83 : vector<4x5x5xf32>
    "tpu.trace_start"() <{level = 10 : i32, message = "hqk,hkd->hqd"}> : () -> ()
    %cst_28 = arith.constant dense<0.000000e+00> : vector<4x5x32xf32>
    %85 = tpu.matmul %84, %71, %cst_28 {dimension_numbers = #tpu.dot_dimension_numbers<[2], [1], [1], [2], [0, 0, 0, 1, 1, 2], [0], [0]>} : vector<4x5x5xf32>, vector<4x5x32xf32>, vector<4x5x32xf32> -> vector<4x5x32xf32>
    "tpu.trace_stop"() : () -> ()
    %c0_29 = arith.constant 0 : index
    %c0_30 = arith.constant 0 : index
    %86 = vector.load %arg11[%c0_29, %c0_30] : memref<1x128xf32, #tpu.memory_space<vmem>>, vector<1x128xf32>
    %87 = vector.extract_strided_slice %85 {offsets = [0, 0, 0], sizes = [1, 5, 32], strides = [1, 1, 1]} : vector<4x5x32xf32> to vector<1x5x32xf32>
    %88 = vector.shape_cast %87 : vector<1x5x32xf32> to vector<5x32xf32>
    %89 = arith.truncf %88 : vector<5x32xf32> to vector<5x32xbf16>
    %c0_31 = arith.constant 0 : index
    %c0_32 = arith.constant 0 : index
    %c0_33 = arith.constant 0 : index
    %90 = vector.load %arg10[%c0_31, %c0_32, %c0_33] : memref<4x32x128xbf16, #tpu.memory_space<vmem>>, vector<1x32x128xbf16>
    %91 = vector.shape_cast %90 : vector<1x32x128xbf16> to vector<32x128xbf16>
    %cst_34 = arith.constant dense<0.000000e+00> : vector<5x128xf32>
    %92 = tpu.matmul %89, %91, %cst_34 {dimension_numbers = #tpu.dot_dimension_numbers<[1], [0], [0], [1], [0, 0, 1, 1], [], []>} : vector<5x32xbf16>, vector<32x128xbf16>, vector<5x128xf32> -> vector<5x128xf32>
    %93 = vector.broadcast %86 : vector<1x128xf32> to vector<5x128xf32>
    %94 = arith.addf %93, %92 : vector<5x128xf32>
    %95 = vector.extract_strided_slice %85 {offsets = [1, 0, 0], sizes = [1, 5, 32], strides = [1, 1, 1]} : vector<4x5x32xf32> to vector<1x5x32xf32>
    %96 = vector.shape_cast %95 : vector<1x5x32xf32> to vector<5x32xf32>
    %97 = arith.truncf %96 : vector<5x32xf32> to vector<5x32xbf16>
    %c1 = arith.constant 1 : index
    %c0_35 = arith.constant 0 : index
    %c0_36 = arith.constant 0 : index
    %98 = vector.load %arg10[%c1, %c0_35, %c0_36] : memref<4x32x128xbf16, #tpu.memory_space<vmem>>, vector<1x32x128xbf16>
    %99 = vector.shape_cast %98 : vector<1x32x128xbf16> to vector<32x128xbf16>
    %cst_37 = arith.constant dense<0.000000e+00> : vector<5x128xf32>
    %100 = tpu.matmul %97, %99, %cst_37 {dimension_numbers = #tpu.dot_dimension_numbers<[1], [0], [0], [1], [0, 0, 1, 1], [], []>} : vector<5x32xbf16>, vector<32x128xbf16>, vector<5x128xf32> -> vector<5x128xf32>
    %101 = arith.addf %94, %100 : vector<5x128xf32>
    %102 = vector.extract_strided_slice %85 {offsets = [2, 0, 0], sizes = [1, 5, 32], strides = [1, 1, 1]} : vector<4x5x32xf32> to vector<1x5x32xf32>
    %103 = vector.shape_cast %102 : vector<1x5x32xf32> to vector<5x32xf32>
    %104 = arith.truncf %103 : vector<5x32xf32> to vector<5x32xbf16>
    %c2 = arith.constant 2 : index
    %c0_38 = arith.constant 0 : index
    %c0_39 = arith.constant 0 : index
    %105 = vector.load %arg10[%c2, %c0_38, %c0_39] : memref<4x32x128xbf16, #tpu.memory_space<vmem>>, vector<1x32x128xbf16>
    %106 = vector.shape_cast %105 : vector<1x32x128xbf16> to vector<32x128xbf16>
    %cst_40 = arith.constant dense<0.000000e+00> : vector<5x128xf32>
    %107 = tpu.matmul %104, %106, %cst_40 {dimension_numbers = #tpu.dot_dimension_numbers<[1], [0], [0], [1], [0, 0, 1, 1], [], []>} : vector<5x32xbf16>, vector<32x128xbf16>, vector<5x128xf32> -> vector<5x128xf32>
    %108 = arith.addf %101, %107 : vector<5x128xf32>
    %109 = vector.extract_strided_slice %85 {offsets = [3, 0, 0], sizes = [1, 5, 32], strides = [1, 1, 1]} : vector<4x5x32xf32> to vector<1x5x32xf32>
    %110 = vector.shape_cast %109 : vector<1x5x32xf32> to vector<5x32xf32>
    %111 = arith.truncf %110 : vector<5x32xf32> to vector<5x32xbf16>
    %c3 = arith.constant 3 : index
    %c0_41 = arith.constant 0 : index
    %c0_42 = arith.constant 0 : index
    %112 = vector.load %arg10[%c3, %c0_41, %c0_42] : memref<4x32x128xbf16, #tpu.memory_space<vmem>>, vector<1x32x128xbf16>
    %113 = vector.shape_cast %112 : vector<1x32x128xbf16> to vector<32x128xbf16>
    %cst_43 = arith.constant dense<0.000000e+00> : vector<5x128xf32>
    %114 = tpu.matmul %111, %113, %cst_43 {dimension_numbers = #tpu.dot_dimension_numbers<[1], [0], [0], [1], [0, 0, 1, 1], [], []>} : vector<5x32xbf16>, vector<32x128xbf16>, vector<5x128xf32> -> vector<5x128xf32>
    %115 = arith.addf %108, %114 : vector<5x128xf32>
    %116 = arith.addf %11, %115 : vector<5x128xf32>
    %c0_44 = arith.constant 0 : index
    %c0_45 = arith.constant 0 : index
    %117 = vector.load %arg12[%c0_44, %c0_45] : memref<1x128xf32, #tpu.memory_space<vmem>>, vector<1x128xf32>
    %c0_46 = arith.constant 0 : index
    %c0_47 = arith.constant 0 : index
    %118 = vector.load %arg13[%c0_46, %c0_47] : memref<1x128xf32, #tpu.memory_space<vmem>>, vector<1x128xf32>
    %cst_48 = arith.constant dense<0.000000e+00> : vector<5xf32>
    %119 = vector.multi_reduction <add>, %116, %cst_48 [1] : vector<5x128xf32> to vector<5xf32>
    %120 = vector.shape_cast %119 : vector<5xf32> to vector<5x1xf32>
    %cst_49 = arith.constant 1.280000e+02 : f32
    %121 = vector.broadcast %cst_49 : f32 to vector<5x1xf32>
    %122 = arith.divf %120, %121 : vector<5x1xf32>
    %123 = arith.mulf %116, %116 : vector<5x128xf32>
    %cst_50 = arith.constant dense<0.000000e+00> : vector<5xf32>
    %124 = vector.multi_reduction <add>, %123, %cst_50 [1] : vector<5x128xf32> to vector<5xf32>
    %125 = vector.shape_cast %124 : vector<5xf32> to vector<5x1xf32>
    %cst_51 = arith.constant 1.280000e+02 : f32
    %126 = vector.broadcast %cst_51 : f32 to vector<5x1xf32>
    %127 = arith.divf %125, %126 : vector<5x1xf32>
    %128 = arith.mulf %122, %122 : vector<5x1xf32>
    %129 = arith.subf %127, %128 : vector<5x1xf32>
    %130 = vector.broadcast %122 : vector<5x1xf32> to vector<5x128xf32>
    %131 = arith.subf %116, %130 : vector<5x128xf32>
    %cst_52 = arith.constant 9.99999997E-7 : f32
    %132 = vector.broadcast %cst_52 : f32 to vector<5x1xf32>
    %133 = arith.addf %129, %132 : vector<5x1xf32>
    %134 = math.rsqrt %133 : vector<5x1xf32>
    %135 = vector.broadcast %134 : vector<5x1xf32> to vector<5x128xf32>
    %136 = arith.mulf %131, %135 : vector<5x128xf32>
    %137 = vector.broadcast %117 : vector<1x128xf32> to vector<5x128xf32>
    %138 = arith.mulf %136, %137 : vector<5x128xf32>
    %139 = vector.broadcast %118 : vector<1x128xf32> to vector<5x128xf32>
    %140 = arith.addf %138, %139 : vector<5x128xf32>
    %141 = arith.truncf %140 : vector<5x128xf32> to vector<5x128xbf16>
    %c0_53 = arith.constant 0 : index
    %c0_54 = arith.constant 0 : index
    %142 = vector.load %arg14[%c0_53, %c0_54] : memref<128x256xbf16, #tpu.memory_space<vmem>>, vector<128x256xbf16>
    %cst_55 = arith.constant dense<0.000000e+00> : vector<5x256xf32>
    %143 = tpu.matmul %141, %142, %cst_55 {dimension_numbers = #tpu.dot_dimension_numbers<[1], [0], [0], [1], [0, 0, 1, 1], [], []>} : vector<5x128xbf16>, vector<128x256xbf16>, vector<5x256xf32> -> vector<5x256xf32>
    %c0_56 = arith.constant 0 : index
    %c0_57 = arith.constant 0 : index
    %144 = vector.load %arg15[%c0_56, %c0_57] : memref<1x256xf32, #tpu.memory_space<vmem>>, vector<1x256xf32>
    %145 = vector.broadcast %144 : vector<1x256xf32> to vector<5x256xf32>
    %146 = arith.addf %143, %145 : vector<5x256xf32>
    %cst_58 = arith.constant 5.000000e-01 : f32
    %147 = vector.broadcast %cst_58 : f32 to vector<5x256xf32>
    %148 = arith.mulf %147, %146 : vector<5x256xf32>
    %cst_59 = arith.constant 4.471500e-02 : f32
    %149 = vector.broadcast %cst_59 : f32 to vector<5x256xf32>
    %150 = arith.mulf %149, %146 : vector<5x256xf32>
    %151 = arith.mulf %150, %146 : vector<5x256xf32>
    %152 = arith.mulf %151, %146 : vector<5x256xf32>
    %153 = arith.addf %146, %152 : vector<5x256xf32>
    %cst_60 = arith.constant 0.797884583 : f32
    %154 = vector.broadcast %cst_60 : f32 to vector<5x256xf32>
    %155 = arith.mulf %154, %153 : vector<5x256xf32>
    %156 = math.tanh %155 : vector<5x256xf32>
    %cst_61 = arith.constant 1.000000e+00 : f32
    %157 = vector.broadcast %cst_61 : f32 to vector<5x256xf32>
    %158 = arith.addf %157, %156 : vector<5x256xf32>
    %159 = arith.mulf %148, %158 : vector<5x256xf32>
    %160 = arith.truncf %159 : vector<5x256xf32> to vector<5x256xbf16>
    %c0_62 = arith.constant 0 : index
    %c0_63 = arith.constant 0 : index
    %161 = vector.load %arg16[%c0_62, %c0_63] : memref<256x128xbf16, #tpu.memory_space<vmem>>, vector<256x128xbf16>
    %cst_64 = arith.constant dense<0.000000e+00> : vector<5x128xf32>
    %162 = tpu.matmul %160, %161, %cst_64 {dimension_numbers = #tpu.dot_dimension_numbers<[1], [0], [0], [1], [0, 0, 1, 1], [], []>} : vector<5x256xbf16>, vector<256x128xbf16>, vector<5x128xf32> -> vector<5x128xf32>
    %c0_65 = arith.constant 0 : index
    %c0_66 = arith.constant 0 : index
    %163 = vector.load %arg17[%c0_65, %c0_66] : memref<1x128xf32, #tpu.memory_space<vmem>>, vector<1x128xf32>
    %164 = vector.broadcast %163 : vector<1x128xf32> to vector<5x128xf32>
    %165 = arith.addf %162, %164 : vector<5x128xf32>
    %166 = arith.addf %116, %165 : vector<5x128xf32>
    %c0_67 = arith.constant 0 : index
    %c0_68 = arith.constant 0 : index
    %167 = vector.load %arg18[%c0_67, %c0_68] : memref<1x128xf32, #tpu.memory_space<vmem>>, vector<1x128xf32>
    %c0_69 = arith.constant 0 : index
    %c0_70 = arith.constant 0 : index
    %168 = vector.load %arg19[%c0_69, %c0_70] : memref<1x128xf32, #tpu.memory_space<vmem>>, vector<1x128xf32>
    %cst_71 = arith.constant dense<0.000000e+00> : vector<5xf32>
    %169 = vector.multi_reduction <add>, %166, %cst_71 [1] : vector<5x128xf32> to vector<5xf32>
    %170 = vector.shape_cast %169 : vector<5xf32> to vector<5x1xf32>
    %cst_72 = arith.constant 1.280000e+02 : f32
    %171 = vector.broadcast %cst_72 : f32 to vector<5x1xf32>
    %172 = arith.divf %170, %171 : vector<5x1xf32>
    %173 = arith.mulf %166, %166 : vector<5x128xf32>
    %cst_73 = arith.constant dense<0.000000e+00> : vector<5xf32>
    %174 = vector.multi_reduction <add>, %173, %cst_73 [1] : vector<5x128xf32> to vector<5xf32>
    %175 = vector.shape_cast %174 : vector<5xf32> to vector<5x1xf32>
    %cst_74 = arith.constant 1.280000e+02 : f32
    %176 = vector.broadcast %cst_74 : f32 to vector<5x1xf32>
    %177 = arith.divf %175, %176 : vector<5x1xf32>
    %178 = arith.mulf %172, %172 : vector<5x1xf32>
    %179 = arith.subf %177, %178 : vector<5x1xf32>
    %180 = vector.broadcast %172 : vector<5x1xf32> to vector<5x128xf32>
    %181 = arith.subf %166, %180 : vector<5x128xf32>
    %cst_75 = arith.constant 9.99999997E-7 : f32
    %182 = vector.broadcast %cst_75 : f32 to vector<5x1xf32>
    %183 = arith.addf %179, %182 : vector<5x1xf32>
    %184 = math.rsqrt %183 : vector<5x1xf32>
    %185 = vector.broadcast %184 : vector<5x1xf32> to vector<5x128xf32>
    %186 = arith.mulf %181, %185 : vector<5x128xf32>
    %187 = vector.broadcast %167 : vector<1x128xf32> to vector<5x128xf32>
    %188 = arith.mulf %186, %187 : vector<5x128xf32>
    %189 = vector.broadcast %168 : vector<1x128xf32> to vector<5x128xf32>
    %190 = arith.addf %188, %189 : vector<5x128xf32>
    %191 = arith.truncf %190 : vector<5x128xf32> to vector<5x128xbf16>
    %c0_76 = arith.constant 0 : index
    %c0_77 = arith.constant 0 : index
    %192 = vector.load %arg20[%c0_76, %c0_77] : memref<128x384xbf16, #tpu.memory_space<vmem>>, vector<128x384xbf16>
    %cst_78 = arith.constant dense<0.000000e+00> : vector<5x384xf32>
    %193 = tpu.matmul %191, %192, %cst_78 {dimension_numbers = #tpu.dot_dimension_numbers<[1], [0], [0], [1], [0, 0, 1, 1], [], []>} : vector<5x128xbf16>, vector<128x384xbf16>, vector<5x384xf32> -> vector<5x384xf32>
    %c0_79 = arith.constant 0 : index
    %c0_80 = arith.constant 0 : index
    %194 = vector.load %arg21[%c0_79, %c0_80] : memref<1x384xf32, #tpu.memory_space<vmem>>, vector<1x384xf32>
    %195 = vector.broadcast %194 : vector<1x384xf32> to vector<5x384xf32>
    %196 = arith.addf %193, %195 : vector<5x384xf32>
    %197 = vector.extract_strided_slice %196 {offsets = [0, 0], sizes = [5, 128], strides = [1, 1]} : vector<5x384xf32> to vector<5x128xf32>
    %198 = vector.extract_strided_slice %196 {offsets = [0, 128], sizes = [5, 128], strides = [1, 1]} : vector<5x384xf32> to vector<5x128xf32>
    %199 = vector.extract_strided_slice %196 {offsets = [0, 256], sizes = [5, 128], strides = [1, 1]} : vector<5x384xf32> to vector<5x128xf32>
    %200 = vector.extract_strided_slice %197 {offsets = [0, 0], sizes = [5, 32], strides = [1, 1]} : vector<5x128xf32> to vector<5x32xf32>
    %201 = vector.extract_strided_slice %197 {offsets = [0, 32], sizes = [5, 32], strides = [1, 1]} : vector<5x128xf32> to vector<5x32xf32>
    %202 = vector.extract_strided_slice %197 {offsets = [0, 64], sizes = [5, 32], strides = [1, 1]} : vector<5x128xf32> to vector<5x32xf32>
    %203 = vector.extract_strided_slice %197 {offsets = [0, 96], sizes = [5, 32], strides = [1, 1]} : vector<5x128xf32> to vector<5x32xf32>
    %204 = vector.shape_cast %200 : vector<5x32xf32> to vector<1x5x32xf32>
    %205 = vector.shape_cast %201 : vector<5x32xf32> to vector<1x5x32xf32>
    %206 = vector.shape_cast %202 : vector<5x32xf32> to vector<1x5x32xf32>
    %207 = vector.shape_cast %203 : vector<5x32xf32> to vector<1x5x32xf32>
    %208 = tpu.concatenate %204, %205, %206, %207 in 0 : vector<1x5x32xf32>, vector<1x5x32xf32>, vector<1x5x32xf32>, vector<1x5x32xf32> -> vector<4x5x32xf32>
    %209 = vector.extract_strided_slice %198 {offsets = [0, 0], sizes = [5, 32], strides = [1, 1]} : vector<5x128xf32> to vector<5x32xf32>
    %210 = vector.extract_strided_slice %198 {offsets = [0, 32], sizes = [5, 32], strides = [1, 1]} : vector<5x128xf32> to vector<5x32xf32>
    %211 = vector.extract_strided_slice %198 {offsets = [0, 64], sizes = [5, 32], strides = [1, 1]} : vector<5x128xf32> to vector<5x32xf32>
    %212 = vector.extract_strided_slice %198 {offsets = [0, 96], sizes = [5, 32], strides = [1, 1]} : vector<5x128xf32> to vector<5x32xf32>
    %213 = vector.shape_cast %209 : vector<5x32xf32> to vector<1x5x32xf32>
    %214 = vector.shape_cast %210 : vector<5x32xf32> to vector<1x5x32xf32>
    %215 = vector.shape_cast %211 : vector<5x32xf32> to vector<1x5x32xf32>
    %216 = vector.shape_cast %212 : vector<5x32xf32> to vector<1x5x32xf32>
    %217 = tpu.concatenate %213, %214, %215, %216 in 0 : vector<1x5x32xf32>, vector<1x5x32xf32>, vector<1x5x32xf32>, vector<1x5x32xf32> -> vector<4x5x32xf32>
    %218 = vector.extract_strided_slice %199 {offsets = [0, 0], sizes = [5, 32], strides = [1, 1]} : vector<5x128xf32> to vector<5x32xf32>
    %219 = vector.extract_strided_slice %199 {offsets = [0, 32], sizes = [5, 32], strides = [1, 1]} : vector<5x128xf32> to vector<5x32xf32>
    %220 = vector.extract_strided_slice %199 {offsets = [0, 64], sizes = [5, 32], strides = [1, 1]} : vector<5x128xf32> to vector<5x32xf32>
    %221 = vector.extract_strided_slice %199 {offsets = [0, 96], sizes = [5, 32], strides = [1, 1]} : vector<5x128xf32> to vector<5x32xf32>
    %222 = vector.shape_cast %218 : vector<5x32xf32> to vector<1x5x32xf32>
    %223 = vector.shape_cast %219 : vector<5x32xf32> to vector<1x5x32xf32>
    %224 = vector.shape_cast %220 : vector<5x32xf32> to vector<1x5x32xf32>
    %225 = vector.shape_cast %221 : vector<5x32xf32> to vector<1x5x32xf32>
    %226 = tpu.concatenate %222, %223, %224, %225 in 0 : vector<1x5x32xf32>, vector<1x5x32xf32>, vector<1x5x32xf32>, vector<1x5x32xf32> -> vector<4x5x32xf32>
    "tpu.trace_start"() <{level = 10 : i32, message = "hqd,hkd->hqk"}> : () -> ()
    %cst_81 = arith.constant dense<0.000000e+00> : vector<4x5x5xf32>
    %227 = tpu.matmul %208, %217, %cst_81 {dimension_numbers = #tpu.dot_dimension_numbers<[2], [2], [1], [1], [0, 0, 0, 1, 1, 1], [0], [0]>} : vector<4x5x32xf32>, vector<4x5x32xf32>, vector<4x5x5xf32> -> vector<4x5x5xf32>
    "tpu.trace_stop"() : () -> ()
    %cst_82 = arith.constant 0.176776692 : f32
    %228 = vector.broadcast %cst_82 : f32 to vector<4x5x5xf32>
    %229 = arith.mulf %227, %228 : vector<4x5x5xf32>
    %cst_83 = arith.constant dense<0xFF800000> : vector<4x5xf32>
    %230 = vector.multi_reduction <maximumf>, %229, %cst_83 [2] : vector<4x5x5xf32> to vector<4x5xf32>
    %231 = vector.shape_cast %230 : vector<4x5xf32> to vector<4x5x1xf32>
    %232 = vector.broadcast %231 : vector<4x5x1xf32> to vector<4x5x5xf32>
    %233 = arith.subf %229, %232 : vector<4x5x5xf32>
    %234 = math.exp %233 : vector<4x5x5xf32>
    %cst_84 = arith.constant dense<0.000000e+00> : vector<4x5xf32>
    %235 = vector.multi_reduction <add>, %234, %cst_84 [2] : vector<4x5x5xf32> to vector<4x5xf32>
    %236 = vector.shape_cast %235 : vector<4x5xf32> to vector<4x5x1xf32>
    %237 = tpu.reciprocal %236 {approx = true} : vector<4x5x1xf32> -> vector<4x5x1xf32>
    %238 = vector.broadcast %237 : vector<4x5x1xf32> to vector<4x5x5xf32>
    %239 = arith.mulf %234, %238 : vector<4x5x5xf32>
    "tpu.trace_start"() <{level = 10 : i32, message = "hqk,hkd->hqd"}> : () -> ()
    %cst_85 = arith.constant dense<0.000000e+00> : vector<4x5x32xf32>
    %240 = tpu.matmul %239, %226, %cst_85 {dimension_numbers = #tpu.dot_dimension_numbers<[2], [1], [1], [2], [0, 0, 0, 1, 1, 2], [0], [0]>} : vector<4x5x5xf32>, vector<4x5x32xf32>, vector<4x5x32xf32> -> vector<4x5x32xf32>
    "tpu.trace_stop"() : () -> ()
    %c0_86 = arith.constant 0 : index
    %c0_87 = arith.constant 0 : index
    %241 = vector.load %arg23[%c0_86, %c0_87] : memref<1x128xf32, #tpu.memory_space<vmem>>, vector<1x128xf32>
    %242 = vector.extract_strided_slice %240 {offsets = [0, 0, 0], sizes = [1, 5, 32], strides = [1, 1, 1]} : vector<4x5x32xf32> to vector<1x5x32xf32>
    %243 = vector.shape_cast %242 : vector<1x5x32xf32> to vector<5x32xf32>
    %244 = arith.truncf %243 : vector<5x32xf32> to vector<5x32xbf16>
    %c0_88 = arith.constant 0 : index
    %c0_89 = arith.constant 0 : index
    %c0_90 = arith.constant 0 : index
    %245 = vector.load %arg22[%c0_88, %c0_89, %c0_90] : memref<4x32x128xbf16, #tpu.memory_space<vmem>>, vector<1x32x128xbf16>
    %246 = vector.shape_cast %245 : vector<1x32x128xbf16> to vector<32x128xbf16>
    %cst_91 = arith.constant dense<0.000000e+00> : vector<5x128xf32>
    %247 = tpu.matmul %244, %246, %cst_91 {dimension_numbers = #tpu.dot_dimension_numbers<[1], [0], [0], [1], [0, 0, 1, 1], [], []>} : vector<5x32xbf16>, vector<32x128xbf16>, vector<5x128xf32> -> vector<5x128xf32>
    %248 = vector.broadcast %241 : vector<1x128xf32> to vector<5x128xf32>
    %249 = arith.addf %248, %247 : vector<5x128xf32>
    %250 = vector.extract_strided_slice %240 {offsets = [1, 0, 0], sizes = [1, 5, 32], strides = [1, 1, 1]} : vector<4x5x32xf32> to vector<1x5x32xf32>
    %251 = vector.shape_cast %250 : vector<1x5x32xf32> to vector<5x32xf32>
    %252 = arith.truncf %251 : vector<5x32xf32> to vector<5x32xbf16>
    %c1_92 = arith.constant 1 : index
    %c0_93 = arith.constant 0 : index
    %c0_94 = arith.constant 0 : index
    %253 = vector.load %arg22[%c1_92, %c0_93, %c0_94] : memref<4x32x128xbf16, #tpu.memory_space<vmem>>, vector<1x32x128xbf16>
    %254 = vector.shape_cast %253 : vector<1x32x128xbf16> to vector<32x128xbf16>
    %cst_95 = arith.constant dense<0.000000e+00> : vector<5x128xf32>
    %255 = tpu.matmul %252, %254, %cst_95 {dimension_numbers = #tpu.dot_dimension_numbers<[1], [0], [0], [1], [0, 0, 1, 1], [], []>} : vector<5x32xbf16>, vector<32x128xbf16>, vector<5x128xf32> -> vector<5x128xf32>
    %256 = arith.addf %249, %255 : vector<5x128xf32>
    %257 = vector.extract_strided_slice %240 {offsets = [2, 0, 0], sizes = [1, 5, 32], strides = [1, 1, 1]} : vector<4x5x32xf32> to vector<1x5x32xf32>
    %258 = vector.shape_cast %257 : vector<1x5x32xf32> to vector<5x32xf32>
    %259 = arith.truncf %258 : vector<5x32xf32> to vector<5x32xbf16>
    %c2_96 = arith.constant 2 : index
    %c0_97 = arith.constant 0 : index
    %c0_98 = arith.constant 0 : index
    %260 = vector.load %arg22[%c2_96, %c0_97, %c0_98] : memref<4x32x128xbf16, #tpu.memory_space<vmem>>, vector<1x32x128xbf16>
    %261 = vector.shape_cast %260 : vector<1x32x128xbf16> to vector<32x128xbf16>
    %cst_99 = arith.constant dense<0.000000e+00> : vector<5x128xf32>
    %262 = tpu.matmul %259, %261, %cst_99 {dimension_numbers = #tpu.dot_dimension_numbers<[1], [0], [0], [1], [0, 0, 1, 1], [], []>} : vector<5x32xbf16>, vector<32x128xbf16>, vector<5x128xf32> -> vector<5x128xf32>
    %263 = arith.addf %256, %262 : vector<5x128xf32>
    %264 = vector.extract_strided_slice %240 {offsets = [3, 0, 0], sizes = [1, 5, 32], strides = [1, 1, 1]} : vector<4x5x32xf32> to vector<1x5x32xf32>
    %265 = vector.shape_cast %264 : vector<1x5x32xf32> to vector<5x32xf32>
    %266 = arith.truncf %265 : vector<5x32xf32> to vector<5x32xbf16>
    %c3_100 = arith.constant 3 : index
    %c0_101 = arith.constant 0 : index
    %c0_102 = arith.constant 0 : index
    %267 = vector.load %arg22[%c3_100, %c0_101, %c0_102] : memref<4x32x128xbf16, #tpu.memory_space<vmem>>, vector<1x32x128xbf16>
    %268 = vector.shape_cast %267 : vector<1x32x128xbf16> to vector<32x128xbf16>
    %cst_103 = arith.constant dense<0.000000e+00> : vector<5x128xf32>
    %269 = tpu.matmul %266, %268, %cst_103 {dimension_numbers = #tpu.dot_dimension_numbers<[1], [0], [0], [1], [0, 0, 1, 1], [], []>} : vector<5x32xbf16>, vector<32x128xbf16>, vector<5x128xf32> -> vector<5x128xf32>
    %270 = arith.addf %263, %269 : vector<5x128xf32>
    %271 = arith.addf %166, %270 : vector<5x128xf32>
    %c0_104 = arith.constant 0 : index
    %c0_105 = arith.constant 0 : index
    %272 = vector.load %arg24[%c0_104, %c0_105] : memref<1x128xf32, #tpu.memory_space<vmem>>, vector<1x128xf32>
    %c0_106 = arith.constant 0 : index
    %c0_107 = arith.constant 0 : index
    %273 = vector.load %arg25[%c0_106, %c0_107] : memref<1x128xf32, #tpu.memory_space<vmem>>, vector<1x128xf32>
    %cst_108 = arith.constant dense<0.000000e+00> : vector<5xf32>
    %274 = vector.multi_reduction <add>, %271, %cst_108 [1] : vector<5x128xf32> to vector<5xf32>
    %275 = vector.shape_cast %274 : vector<5xf32> to vector<5x1xf32>
    %cst_109 = arith.constant 1.280000e+02 : f32
    %276 = vector.broadcast %cst_109 : f32 to vector<5x1xf32>
    %277 = arith.divf %275, %276 : vector<5x1xf32>
    %278 = arith.mulf %271, %271 : vector<5x128xf32>
    %cst_110 = arith.constant dense<0.000000e+00> : vector<5xf32>
    %279 = vector.multi_reduction <add>, %278, %cst_110 [1] : vector<5x128xf32> to vector<5xf32>
    %280 = vector.shape_cast %279 : vector<5xf32> to vector<5x1xf32>
    %cst_111 = arith.constant 1.280000e+02 : f32
    %281 = vector.broadcast %cst_111 : f32 to vector<5x1xf32>
    %282 = arith.divf %280, %281 : vector<5x1xf32>
    %283 = arith.mulf %277, %277 : vector<5x1xf32>
    %284 = arith.subf %282, %283 : vector<5x1xf32>
    %285 = vector.broadcast %277 : vector<5x1xf32> to vector<5x128xf32>
    %286 = arith.subf %271, %285 : vector<5x128xf32>
    %cst_112 = arith.constant 9.99999997E-7 : f32
    %287 = vector.broadcast %cst_112 : f32 to vector<5x1xf32>
    %288 = arith.addf %284, %287 : vector<5x1xf32>
    %289 = math.rsqrt %288 : vector<5x1xf32>
    %290 = vector.broadcast %289 : vector<5x1xf32> to vector<5x128xf32>
    %291 = arith.mulf %286, %290 : vector<5x128xf32>
    %292 = vector.broadcast %272 : vector<1x128xf32> to vector<5x128xf32>
    %293 = arith.mulf %291, %292 : vector<5x128xf32>
    %294 = vector.broadcast %273 : vector<1x128xf32> to vector<5x128xf32>
    %295 = arith.addf %293, %294 : vector<5x128xf32>
    %296 = arith.truncf %295 : vector<5x128xf32> to vector<5x128xbf16>
    %c0_113 = arith.constant 0 : index
    %c0_114 = arith.constant 0 : index
    %297 = vector.load %arg26[%c0_113, %c0_114] : memref<128x256xbf16, #tpu.memory_space<vmem>>, vector<128x256xbf16>
    %cst_115 = arith.constant dense<0.000000e+00> : vector<5x256xf32>
    %298 = tpu.matmul %296, %297, %cst_115 {dimension_numbers = #tpu.dot_dimension_numbers<[1], [0], [0], [1], [0, 0, 1, 1], [], []>} : vector<5x128xbf16>, vector<128x256xbf16>, vector<5x256xf32> -> vector<5x256xf32>
    %c0_116 = arith.constant 0 : index
    %c0_117 = arith.constant 0 : index
    %299 = vector.load %arg27[%c0_116, %c0_117] : memref<1x256xf32, #tpu.memory_space<vmem>>, vector<1x256xf32>
    %300 = vector.broadcast %299 : vector<1x256xf32> to vector<5x256xf32>
    %301 = arith.addf %298, %300 : vector<5x256xf32>
    %cst_118 = arith.constant 5.000000e-01 : f32
    %302 = vector.broadcast %cst_118 : f32 to vector<5x256xf32>
    %303 = arith.mulf %302, %301 : vector<5x256xf32>
    %cst_119 = arith.constant 4.471500e-02 : f32
    %304 = vector.broadcast %cst_119 : f32 to vector<5x256xf32>
    %305 = arith.mulf %304, %301 : vector<5x256xf32>
    %306 = arith.mulf %305, %301 : vector<5x256xf32>
    %307 = arith.mulf %306, %301 : vector<5x256xf32>
    %308 = arith.addf %301, %307 : vector<5x256xf32>
    %cst_120 = arith.constant 0.797884583 : f32
    %309 = vector.broadcast %cst_120 : f32 to vector<5x256xf32>
    %310 = arith.mulf %309, %308 : vector<5x256xf32>
    %311 = math.tanh %310 : vector<5x256xf32>
    %cst_121 = arith.constant 1.000000e+00 : f32
    %312 = vector.broadcast %cst_121 : f32 to vector<5x256xf32>
    %313 = arith.addf %312, %311 : vector<5x256xf32>
    %314 = arith.mulf %303, %313 : vector<5x256xf32>
    %315 = arith.truncf %314 : vector<5x256xf32> to vector<5x256xbf16>
    %c0_122 = arith.constant 0 : index
    %c0_123 = arith.constant 0 : index
    %316 = vector.load %arg28[%c0_122, %c0_123] : memref<256x128xbf16, #tpu.memory_space<vmem>>, vector<256x128xbf16>
    %cst_124 = arith.constant dense<0.000000e+00> : vector<5x128xf32>
    %317 = tpu.matmul %315, %316, %cst_124 {dimension_numbers = #tpu.dot_dimension_numbers<[1], [0], [0], [1], [0, 0, 1, 1], [], []>} : vector<5x256xbf16>, vector<256x128xbf16>, vector<5x128xf32> -> vector<5x128xf32>
    %c0_125 = arith.constant 0 : index
    %c0_126 = arith.constant 0 : index
    %318 = vector.load %arg29[%c0_125, %c0_126] : memref<1x128xf32, #tpu.memory_space<vmem>>, vector<1x128xf32>
    %319 = vector.broadcast %318 : vector<1x128xf32> to vector<5x128xf32>
    %320 = arith.addf %317, %319 : vector<5x128xf32>
    %321 = arith.addf %271, %320 : vector<5x128xf32>
    %322 = vector.extract_strided_slice %321 {offsets = [0, 0], sizes = [1, 128], strides = [1, 1]} : vector<5x128xf32> to vector<1x128xf32>
    %c0_127 = arith.constant 0 : index
    %c0_128 = arith.constant 0 : index
    %323 = vector.load %arg30[%c0_127, %c0_128] : memref<1x128xf32, #tpu.memory_space<vmem>>, vector<1x128xf32>
    %c0_129 = arith.constant 0 : index
    %c0_130 = arith.constant 0 : index
    %324 = vector.load %arg31[%c0_129, %c0_130] : memref<1x128xf32, #tpu.memory_space<vmem>>, vector<1x128xf32>
    %cst_131 = arith.constant dense<0.000000e+00> : vector<1xf32>
    %325 = vector.multi_reduction <add>, %322, %cst_131 [1] : vector<1x128xf32> to vector<1xf32>
    %326 = vector.shape_cast %325 : vector<1xf32> to vector<1x1xf32>
    %cst_132 = arith.constant 1.280000e+02 : f32
    %327 = vector.broadcast %cst_132 : f32 to vector<1x1xf32>
    %328 = arith.divf %326, %327 : vector<1x1xf32>
    %329 = arith.mulf %322, %322 : vector<1x128xf32>
    %cst_133 = arith.constant dense<0.000000e+00> : vector<1xf32>
    %330 = vector.multi_reduction <add>, %329, %cst_133 [1] : vector<1x128xf32> to vector<1xf32>
    %331 = vector.shape_cast %330 : vector<1xf32> to vector<1x1xf32>
    %cst_134 = arith.constant 1.280000e+02 : f32
    %332 = vector.broadcast %cst_134 : f32 to vector<1x1xf32>
    %333 = arith.divf %331, %332 : vector<1x1xf32>
    %334 = arith.mulf %328, %328 : vector<1x1xf32>
    %335 = arith.subf %333, %334 : vector<1x1xf32>
    %336 = vector.broadcast %328 : vector<1x1xf32> to vector<1x128xf32>
    %337 = arith.subf %322, %336 : vector<1x128xf32>
    %cst_135 = arith.constant 9.99999997E-7 : f32
    %338 = vector.broadcast %cst_135 : f32 to vector<1x1xf32>
    %339 = arith.addf %335, %338 : vector<1x1xf32>
    %340 = math.rsqrt %339 : vector<1x1xf32>
    %341 = vector.broadcast %340 : vector<1x1xf32> to vector<1x128xf32>
    %342 = arith.mulf %337, %341 : vector<1x128xf32>
    %343 = arith.mulf %342, %323 : vector<1x128xf32>
    %344 = arith.addf %343, %324 : vector<1x128xf32>
    %345 = arith.truncf %344 : vector<1x128xf32> to vector<1x128xbf16>
    %c0_136 = arith.constant 0 : index
    %c0_137 = arith.constant 0 : index
    %346 = vector.load %arg32[%c0_136, %c0_137] : memref<128x128xbf16, #tpu.memory_space<vmem>>, vector<128x128xbf16>
    %cst_138 = arith.constant dense<0.000000e+00> : vector<1x128xf32>
    %347 = tpu.matmul %345, %346, %cst_138 {dimension_numbers = #tpu.dot_dimension_numbers<[1], [0], [0], [1], [0, 0, 1, 1], [], []>} : vector<1x128xbf16>, vector<128x128xbf16>, vector<1x128xf32> -> vector<1x128xf32>
    %c0_139 = arith.constant 0 : index
    %c0_140 = arith.constant 0 : index
    %348 = vector.load %arg33[%c0_139, %c0_140] : memref<1x128xf32, #tpu.memory_space<vmem>>, vector<1x128xf32>
    %349 = arith.addf %347, %348 : vector<1x128xf32>
    %350 = vector.shape_cast %349 : vector<1x128xf32> to vector<1x1x128xf32>
    %c0_141 = arith.constant 0 : index
    %c0_142 = arith.constant 0 : index
    %c0_143 = arith.constant 0 : index
    %351 = vector.load %arg34[%c0_141, %c0_142, %c0_143] : memref<1x1x128xf32, #tpu.memory_space<vmem>>, vector<1x1x128xf32>
    tpu.vector_store %arg34[%c0_141, %c0_142, %c0_143], %350 {strides = array<i32>} : memref<1x1x128xf32, #tpu.memory_space<vmem>>, vector<1x1x128xf32>,
    return
  }
  func.func @transform_0(%arg0: i32) -> (i32, i32, i32) {
    %c0_i32 = arith.constant 0 : i32
    %c0_i32_0 = arith.constant 0 : i32
    %c0_i32_1 = arith.constant 0 : i32
    return %arg0, %c0_i32, %c0_i32_0 : i32, i32, i32
  }
  func.func @transform_1(%arg0: i32) -> (i32, i32) {
    %c0_i32 = arith.constant 0 : i32
    %c0_i32_0 = arith.constant 0 : i32
    %c0_i32_1 = arith.constant 0 : i32
    return %c0_i32, %c0_i32_0 : i32, i32
  }
  func.func @transform_2(%arg0: i32) -> (i32, i32) {
    %c0_i32 = arith.constant 0 : i32
    %c0_i32_0 = arith.constant 0 : i32
    %c0_i32_1 = arith.constant 0 : i32
    return %c0_i32, %c0_i32_0 : i32, i32
  }
  func.func @transform_3(%arg0: i32) -> (i32, i32) {
    %c0_i32 = arith.constant 0 : i32
    %c0_i32_0 = arith.constant 0 : i32
    %c0_i32_1 = arith.constant 0 : i32
    return %c0_i32, %c0_i32_0 : i32, i32
  }
  func.func @transform_4(%arg0: i32) -> (i32, i32) {
    %c0_i32 = arith.constant 0 : i32
    %c0_i32_0 = arith.constant 0 : i32
    %c0_i32_1 = arith.constant 0 : i32
    return %c0_i32, %c0_i32_0 : i32, i32
  }
  func.func @transform_5(%arg0: i32) -> (i32, i32) {
    %c0_i32 = arith.constant 0 : i32
    %c0_i32_0 = arith.constant 0 : i32
    %c0_i32_1 = arith.constant 0 : i32
    return %c0_i32, %c0_i32_0 : i32, i32
  }
  func.func @transform_6(%arg0: i32) -> (i32, i32) {
    %c0_i32 = arith.constant 0 : i32
    %c0_i32_0 = arith.constant 0 : i32
    %c0_i32_1 = arith.constant 0 : i32
    return %c0_i32, %c0_i32_0 : i32, i32
  }
  func.func @transform_7(%arg0: i32) -> (i32, i32) {
    %c0_i32 = arith.constant 0 : i32
    %c0_i32_0 = arith.constant 0 : i32
    %c0_i32_1 = arith.constant 0 : i32
    return %c0_i32, %c0_i32_0 : i32, i32
  }
  func.func @transform_8(%arg0: i32) -> (i32, i32) {
    %c0_i32 = arith.constant 0 : i32
    %c0_i32_0 = arith.constant 0 : i32
    %c0_i32_1 = arith.constant 0 : i32
    return %c0_i32, %c0_i32_0 : i32, i32
  }
  func.func @transform_9(%arg0: i32) -> (i32, i32, i32) {
    %c0_i32 = arith.constant 0 : i32
    %c0_i32_0 = arith.constant 0 : i32
    %c0_i32_1 = arith.constant 0 : i32
    %c0_i32_2 = arith.constant 0 : i32
    return %c0_i32, %c0_i32_0, %c0_i32_1 : i32, i32, i32
  }
  func.func @transform_10(%arg0: i32) -> (i32, i32) {
    %c0_i32 = arith.constant 0 : i32
    %c0_i32_0 = arith.constant 0 : i32
    %c0_i32_1 = arith.constant 0 : i32
    return %c0_i32, %c0_i32_0 : i32, i32
  }
  func.func @transform_11(%arg0: i32) -> (i32, i32) {
    %c0_i32 = arith.constant 0 : i32
    %c0_i32_0 = arith.constant 0 : i32
    %c0_i32_1 = arith.constant 0 : i32
    return %c0_i32, %c0_i32_0 : i32, i32
  }
  func.func @transform_12(%arg0: i32) -> (i32, i32) {
    %c0_i32 = arith.constant 0 : i32
    %c0_i32_0 = arith.constant 0 : i32
    %c0_i32_1 = arith.constant 0 : i32
    return %c0_i32, %c0_i32_0 : i32, i32
  }
  func.func @transform_13(%arg0: i32) -> (i32, i32) {
    %c0_i32 = arith.constant 0 : i32
    %c0_i32_0 = arith.constant 0 : i32
    %c0_i32_1 = arith.constant 0 : i32
    return %c0_i32, %c0_i32_0 : i32, i32
  }
  func.func @transform_14(%arg0: i32) -> (i32, i32) {
    %c0_i32 = arith.constant 0 : i32
    %c0_i32_0 = arith.constant 0 : i32
    %c0_i32_1 = arith.constant 0 : i32
    return %c0_i32, %c0_i32_0 : i32, i32
  }
  func.func @transform_15(%arg0: i32) -> (i32, i32) {
    %c0_i32 = arith.constant 0 : i32
    %c0_i32_0 = arith.constant 0 : i32
    %c0_i32_1 = arith.constant 0 : i32
    return %c0_i32, %c0_i32_0 : i32, i32
  }
  func.func @transform_16(%arg0: i32) -> (i32, i32) {
    %c0_i32 = arith.constant 0 : i32
    %c0_i32_0 = arith.constant 0 : i32
    %c0_i32_1 = arith.constant 0 : i32
    return %c0_i32, %c0_i32_0 : i32, i32
  }
  func.func @transform_17(%arg0: i32) -> (i32, i32) {
    %c0_i32 = arith.constant 0 : i32
    %c0_i32_0 = arith.constant 0 : i32
    %c0_i32_1 = arith.constant 0 : i32
    return %c0_i32, %c0_i32_0 : i32, i32
  }
  func.func @transform_18(%arg0: i32) -> (i32, i32) {
    %c0_i32 = arith.constant 0 : i32
    %c0_i32_0 = arith.constant 0 : i32
    %c0_i32_1 = arith.constant 0 : i32
    return %c0_i32, %c0_i32_0 : i32, i32
  }
  func.func @transform_19(%arg0: i32) -> (i32, i32) {
    %c0_i32 = arith.constant 0 : i32
    %c0_i32_0 = arith.constant 0 : i32
    %c0_i32_1 = arith.constant 0 : i32
    return %c0_i32, %c0_i32_0 : i32, i32
  }
  func.func @transform_20(%arg0: i32) -> (i32, i32) {
    %c0_i32 = arith.constant 0 : i32
    %c0_i32_0 = arith.constant 0 : i32
    %c0_i32_1 = arith.constant 0 : i32
    return %c0_i32, %c0_i32_0 : i32, i32
  }
  func.func @transform_21(%arg0: i32) -> (i32, i32, i32) {
    %c0_i32 = arith.constant 0 : i32
    %c0_i32_0 = arith.constant 0 : i32
    %c0_i32_1 = arith.constant 0 : i32
    %c0_i32_2 = arith.constant 0 : i32
    return %c0_i32, %c0_i32_0, %c0_i32_1 : i32, i32, i32
  }
  func.func @transform_22(%arg0: i32) -> (i32, i32) {
    %c0_i32 = arith.constant 0 : i32
    %c0_i32_0 = arith.constant 0 : i32
    %c0_i32_1 = arith.constant 0 : i32
    return %c0_i32, %c0_i32_0 : i32, i32
  }
  func.func @transform_23(%arg0: i32) -> (i32, i32) {
    %c0_i32 = arith.constant 0 : i32
    %c0_i32_0 = arith.constant 0 : i32
    %c0_i32_1 = arith.constant 0 : i32
    return %c0_i32, %c0_i32_0 : i32, i32
  }
  func.func @transform_24(%arg0: i32) -> (i32, i32) {
    %c0_i32 = arith.constant 0 : i32
    %c0_i32_0 = arith.constant 0 : i32
    %c0_i32_1 = arith.constant 0 : i32
    return %c0_i32, %c0_i32_0 : i32, i32
  }
  func.func @transform_25(%arg0: i32) -> (i32, i32) {
    %c0_i32 = arith.constant 0 : i32
    %c0_i32_0 = arith.constant 0 : i32
    %c0_i32_1 = arith.constant 0 : i32
    return %c0_i32, %c0_i32_0 : i32, i32
  }
  func.func @transform_26(%arg0: i32) -> (i32, i32) {
    %c0_i32 = arith.constant 0 : i32
    %c0_i32_0 = arith.constant 0 : i32
    %c0_i32_1 = arith.constant 0 : i32
    return %c0_i32, %c0_i32_0 : i32, i32
  }
  func.func @transform_27(%arg0: i32) -> (i32, i32) {
    %c0_i32 = arith.constant 0 : i32
    %c0_i32_0 = arith.constant 0 : i32
    %c0_i32_1 = arith.constant 0 : i32
    return %c0_i32, %c0_i32_0 : i32, i32
  }
  func.func @transform_28(%arg0: i32) -> (i32, i32) {
    %c0_i32 = arith.constant 0 : i32
    %c0_i32_0 = arith.constant 0 : i32
    %c0_i32_1 = arith.constant 0 : i32
    return %c0_i32, %c0_i32_0 : i32, i32
  }
  func.func @transform_29(%arg0: i32) -> (i32, i32) {
    %c0_i32 = arith.constant 0 : i32
    %c0_i32_0 = arith.constant 0 : i32
    %c0_i32_1 = arith.constant 0 : i32
    return %c0_i32, %c0_i32_0 : i32, i32
  }
  func.func @transform_30(%arg0: i32) -> (i32, i32) {
    %c0_i32 = arith.constant 0 : i32
    %c0_i32_0 = arith.constant 0 : i32
    %c0_i32_1 = arith.constant 0 : i32
    return %c0_i32, %c0_i32_0 : i32, i32
  }
  func.func @transform_31(%arg0: i32) -> (i32, i32) {
    %c0_i32 = arith.constant 0 : i32
    %c0_i32_0 = arith.constant 0 : i32
    %c0_i32_1 = arith.constant 0 : i32
    return %c0_i32, %c0_i32_0 : i32, i32
  }
  func.func @transform_32(%arg0: i32) -> (i32, i32) {
    %c0_i32 = arith.constant 0 : i32
    %c0_i32_0 = arith.constant 0 : i32
    %c0_i32_1 = arith.constant 0 : i32
    return %c0_i32, %c0_i32_0 : i32, i32
  }
  func.func @transform_33(%arg0: i32) -> (i32, i32, i32) {
    %c0_i32 = arith.constant 0 : i32
    %c0_i32_0 = arith.constant 0 : i32
    %c0_i32_1 = arith.constant 0 : i32
    return %arg0, %c0_i32, %c0_i32_0 : i32, i32, i32
  }
}

</mosaic_0001>

<bundles_post_ra>
// kernel: vit_forward.1
= control target key start
LH: loop header
LB: loop body
LE: loop exit
PB: predicated region body
PF: predicated region fallthrough
CT: control target
= control target key end

     0   :  { %s6034_s6 = smov 1   ;;  %s6035_s10 = smov 2   ;;  %s6812_s0 = inlined_call_operand.smem [shape: u32[34], index: -1, kind: input, shape index: {}] }
   0x1   :  { %s6082_s5 = sld [smem:[%s6812_s0]]   ;;  %s6036_s14 = smov 3  }
   0x2   :  { %s6087_s9 = sld [smem:[%s6812_s0 + %s6034_s6]]   ;;  %s6037_s18 = smov 4  }
   0x3   :  { %s6092_s13 = sld [smem:[%s6812_s0 + %s6035_s10]]   ;;  %s6038_s22 = smov 5  }
   0x4   :  { %s6097_s17 = sld [smem:[%s6812_s0 + %s6036_s14]]   ;;  %s6039_s26 = smov 6  }
   0x5   :  { %s6102_s21 = sld [smem:[%s6812_s0 + %s6037_s18]]   ;;  %s6040_s30 = smov 7  }
   0x6   :  { %s6107_s25 = sld [smem:[%s6812_s0 + %s6038_s22]]   ;;  %s6041_s4 = smov 8  }
   0x7   :  { %6830 = sst [smem:[#allocation5_spill]] %s6082_s5  ;;  %s6042_s10 = smov 9  }
   0x8   :  { %6831 = sst [smem:[#allocation6_spill]] %s6087_s9  ;;  %s6043_s15 = smov 10  }
   0x9   :  { %6832 = sst [smem:[#allocation7_spill]] %s6092_s13  ;;  %s6044_s20 = smov 11  }
   0xa   :  { %s6112_s29 = sld [smem:[%s6812_s0 + %s6039_s26]]   ;;  %s6045_s26 = smov 12  }
   0xb   :  { %s6117_s3 = sld [smem:[%s6812_s0 + %s6040_s30]]   ;;  %s6046_s1 = smov 13  }
   0xc   :  { %s6122_s8 = sld [smem:[%s6812_s0 + %s6041_s4]]   ;;  %s6047_s7 = smov 14  }
   0xd   :  { %s6127_s14 = sld [smem:[%s6812_s0 + %s6042_s10]]   ;;  %s6049_s22 = smov 16  }
   0xe   :  { %s6132_s19 = sld [smem:[%s6812_s0 + %s6043_s15]]   ;;  %s6048_s15 = smov 15  }
   0xf   :  { %s6137_s24 = sld [smem:[%s6812_s0 + %s6044_s20]]   ;;  %s6050_s28 = smov 17  }
  0x10   :  { %s6142_s30 = sld [smem:[%s6812_s0 + %s6045_s26]]  }
  0x11   :  { %6833 = sst [smem:[#allocation8_spill]] %s6117_s3 }
  0x12   :  { %6834 = sst [smem:[#allocation9_spill]] %s6122_s8 }
  0x13   :  { %s6147_s6 = sld [smem:[%s6812_s0 + %s6046_s1]]  }
  0x14   :  { %s6152_s12 = sld [smem:[%s6812_s0 + %s6047_s7]]   ;;  %s6051_s7 = smov 18  }
  0x15   :  { %s6157_s20 = sld [smem:[%s6812_s0 + %s6048_s15]]   ;;  %s6052_s15 = smov 19  }
  0x16   :  { %s6162_s27 = sld [smem:[%s6812_s0 + %s6049_s22]]   ;;  %s6053_s22 = smov 20  }
  0x17   :  { %s6167_s4 = sld [smem:[%s6812_s0 + %s6050_s28]]   ;;  %s6054_s28 = smov 21  }
  0x19   :  { %6835 = sst [smem:[#allocation10_spill]] %s6147_s6 }
  0x1a   :  { %6836 = sst [smem:[#allocation11_spill]] %s6152_s12 }
  0x1b   :  { %6837 = sst [smem:[#allocation12_spill]] %s6157_s20 }
  0x1c   :  { %6838 = sst [smem:[#allocation13_spill]] %s6162_s27 }
  0x1d   :  { %6839 = sst [smem:[#allocation14_spill]] %s6167_s4 }
  0x1e   :  { %s6172_s12 = sld [smem:[%s6812_s0 + %s6051_s7]]   ;;  %s6055_s7 = smov 22  }
  0x1f   :  { %s6177_s20 = sld [smem:[%s6812_s0 + %s6052_s15]]   ;;  %s6056_s15 = smov 23  }
  0x20   :  { %s6182_s27 = sld [smem:[%s6812_s0 + %s6053_s22]]   ;;  %s6057_s22 = smov 24  }
  0x21   :  { %s6187_s4 = sld [smem:[%s6812_s0 + %s6054_s28]]   ;;  %s6058_s28 = smov 25  }
  0x24   :  { %6840 = sst [smem:[#allocation15_spill]] %s6172_s12 }
  0x25   :  { %6841 = sst [smem:[#allocation16_spill]] %s6177_s20 }
  0x26   :  { %6842 = sst [smem:[#allocation17_spill]] %s6182_s27 }
  0x27   :  { %6843 = sst [smem:[#allocation18_spill]] %s6187_s4 }
  0x28   :  { %s6192_s12 = sld [smem:[%s6812_s0 + %s6055_s7]]   ;;  %s6059_s7 = smov 26  }
  0x29   :  { %s6197_s20 = sld [smem:[%s6812_s0 + %s6056_s15]]   ;;  %s6060_s15 = smov 27  }
  0x2a   :  { %s6202_s27 = sld [smem:[%s6812_s0 + %s6057_s22]]   ;;  %s6061_s22 = smov 28  }
  0x2b   :  { %s6207_s4 = sld [smem:[%s6812_s0 + %s6058_s28]]   ;;  %s6062_s28 = smov 29  }
  0x2e   :  { %6844 = sst [smem:[#allocation19_spill]] %s6192_s12 }
  0x2f   :  { %6845 = sst [smem:[#allocation20_spill]] %s6197_s20 }
  0x30   :  { %6846 = sst [smem:[#allocation21_spill]] %s6202_s27 }
  0x31   :  { %6847 = sst [smem:[#allocation22_spill]] %s6207_s4 }
  0x32   :  { %s6212_s12 = sld [smem:[%s6812_s0 + %s6059_s7]]   ;;  %s6063_s7 = smov 30  }
  0x33   :  { %s6217_s20 = sld [smem:[%s6812_s0 + %s6060_s15]]   ;;  %s6064_s15 = smov 31  }
  0x34   :  { %s6222_s27 = sld [smem:[%s6812_s0 + %s6061_s22]]   ;;  %s6065_s22 = smov 32  }
  0x35   :  { %s6227_s4 = sld [smem:[%s6812_s0 + %s6062_s28]]   ;;  %s6066_s28 = smov 33  }
  0x38   :  { %6848 = sst [smem:[#allocation23_spill]] %s6212_s12 }
  0x39   :  { %6849 = sst [smem:[#allocation24_spill]] %s6217_s20 }
  0x3a   :  { %6850 = sst [smem:[#allocation25_spill]] %s6222_s27 }
  0x3b   :  { %6851 = sst [smem:[#allocation26_spill]] %s6227_s4 }
  0x3c   :  { %s6232_s12 = sld [smem:[%s6812_s0 + %s6063_s7]]  }
  0x3d   :  { %s6237_s20 = sld [smem:[%s6812_s0 + %s6064_s15]]  }
  0x3e   :  { %s6242_s27 = sld [smem:[%s6812_s0 + %s6065_s22]]  }
  0x3f   :  { %s6247_s4 = sld [smem:[%s6812_s0 + %s6066_s28]]  }
  0x42   :  { %6852 = sst [smem:[#allocation27_spill]] %s6232_s12 }
  0x43   :  { %72 = vsyncpa [#allocation3], 0 }
  0x44   :  { %74 = vsyncpa [#allocation3 + $0x1], 0  ;;  %s6249_s7 = smov 0   ;;  %s6251_s10 = smov 0  }
  0x45   :  { %s6253_s11 = smov 0   ;;  %s6255_s15 = smov 0  }
  0x46 LB: > { %s6853_s9 = sld [smem:[#allocation6_spill]]  ;;  %s6854_s6 = sld [smem:[#allocation10_spill]]  ;;  %s6028_s11 = sphi %s6253_s11, %s6883_s11   ;;  %s6024_s10 = sphi %s6251_s10, %s6882_s10   ;;  %s6020_s7 = sphi %s6249_s7, %s6881_s7   ;;  %s6032_s15 = sphi %s6255_s15, %s6884_s15  }
  0x47   : > { %s6855_s3 = sld [smem:[#allocation8_spill]]  ;;  %s6270_s0 = sadd.s32 4294967295, %s6032_s15  }
  0x48   : > { %s4956_s16 = sadd.s32 4294967294, %s6032_s15   ;;  %s6274_s18 = sadd.s32 1, %s6032_s15  }
  0x49   : > { %s785_s22 = sadd.s32 1, %s6028_s11  ;;  %s782_s23 = ssub.s32 %s6032_s15, %s6274_s18 }
  0x4a   : > { %p795_p0 = scmp.ne.s32.totalorder %s6028_s11, %s6024_s10  ;;  %p783_p1 = scmp.eq.s32.totalorder %s782_s23, 0 }
  0x4b   : > { %p796_p2 = scmp.eq.s32.totalorder %s6270_s0, 1  ;;  %p801_p3 = scmp.ne.s32.totalorder %s6024_s10, %s6020_s7 }
  0x4c   : > { %p802_p4 = scmp.eq.s32.totalorder %s4956_s16, 1  ;;  %p4959_p7 = scmp.ge.s32.totalorder %s6032_s15, 1 }
  0x4d   : > { %s6285_s26 = scalar_select %p783_p1, %s6028_s11, %s785_s22  }
  0x4e   : > { %p6287_p5 = por %p796_p2, %p795_p0  ;;  %p6291_p6 = por %p802_p4, %p801_p3 }
  0x4f   : > { %p924_p8 = scmp.lt.s32.totalorder %s6032_s15, 3 }
  0x51   : > { %p925_p9 = pnand %p4959_p7, %p924_p8 }
  0x52   : > { %v5701_v0 = vld [vmem:[%s6853_s9 + $0x40] sm:$0xff] (!%p925_p9)   ;;  %v5705_v4 = vld [vmem:[%s6853_s9 + $0x48] sm:$0xff] (!%p925_p9)   ;;  %v5709_v8 = vld [vmem:[%s6853_s9 + $0x50] sm:$0xff] (!%p925_p9)   ;;  %p1007_p10 = scmp.lt.s32.totalorder (!%p925_p9), %s6270_s0, 1  ;;  %s6858_s5 = sld [smem:[#allocation5_spill]] (!%p925_p9)  ;;  %v6067_v62 = vmov (!%p925_p9), 0.0  }
  0x53   : > { %928 = sbr.rel (%p925_p9) target bundleno = 5020 (0x139c), region = 152  ;;  %v5702_v1 = vld [vmem:[%s6853_s9] sm:$0xff] (!%p925_p9)   ;;  %5225 = vmatprep.subr.bf16.mxu0 (!%p925_p9), %v5701_v0  ;;  %v5706_v5 = vld [vmem:[%s6853_s9 + $0x8] sm:$0xff] (!%p925_p9)   ;;  %v5710_v9 = vld [vmem:[%s6853_s9 + $0x10] sm:$0xff] (!%p925_p9)   ;;  %s6859_s13 = sld [smem:[#allocation7_spill]] (!%p925_p9)  ;;  %vm1546_vm0 = vcmask (!%p925_p9), 1040384  }
  0x54   : > { %v5703_v2 = vld [vmem:[%s6853_s9 + $0xc0] sm:$0xff] (!%p925_p9)   ;;  %5226 = vmatpush3.bf16.msra.mxu0 (!%p925_p9), %v5702_v1  ;;  %v5707_v6 = vld [vmem:[%s6853_s9 + $0xc8] sm:$0xff] (!%p925_p9)   ;;  %v5711_v10 = vld [vmem:[%s6853_s9 + $0xd0] sm:$0xff] (!%p925_p9)   ;;  %vm1552_vm1 = vcmask (!%p925_p9), 1044480   ;;  %vm6069_vm2 = vmmov (!%p925_p9), 0   ;;  %s6860_s8 = sld [smem:[#allocation9_spill]] (!%p925_p9) }
  0x55   : > { %v5704_v3 = vld [vmem:[%s6853_s9 + $0x80] sm:$0xff] (!%p925_p9)   ;;  %5247 = vmatprep.subr.bf16.mxu1 (!%p925_p9), %v5703_v2  ;;  %5227 = vmatprep.subr.bf16.mxu0 (!%p925_p9), %v5705_v4  ;;  %v5708_v7 = vld [vmem:[%s6853_s9 + $0x88] sm:$0xff] (!%p925_p9)   ;;  %v5712_v11 = vld [vmem:[%s6853_s9 + $0x90] sm:$0xff] (!%p925_p9)   ;;  %vm1863_vm3 = vcmask (!%p925_p9), 261120   ;;  %s6820_s23 = smov (!%p925_p9), 64   ;;  %vm2164_vm4 = vcmask (!%p925_p9), 36864  }
  0x56   : > { %5248 = vmatpush3.bf16.msra.mxu1 (!%p925_p9), %v5704_v3  ;;  %v5713_v12 = vld [vmem:[%s6853_s9 + $0x58] sm:$0xff] (!%p925_p9)   ;;  %v5717_v16 = vld [vmem:[%s6853_s9 + $0x60] sm:$0xff] (!%p925_p9)   ;;  %v5721_v20 = vld [vmem:[%s6853_s9 + $0x68] sm:$0xff] (!%p925_p9)   ;;  %vm2209_vm5 = vcmask (!%p925_p9), 39936   ;;  %s6880_s12 = sld [smem:[#allocation27_spill]] (!%p925_p9) }
  0x57   : > { %5249 = vmatprep.subr.bf16.mxu1 (!%p925_p9), %v5707_v6  ;;  %v5714_v13 = vld [vmem:[%s6853_s9 + $0x18] sm:$0xff] (!%p925_p9)   ;;  %v5718_v17 = vld [vmem:[%s6853_s9 + $0x20] sm:$0xff] (!%p925_p9)   ;;  %v5722_v21 = vld [vmem:[%s6853_s9 + $0x28] sm:$0xff] (!%p925_p9)  }
  0x58   : > { %5228 = vmatpush3.bf16.msra.mxu0 (!%p925_p9), %v5706_v5  ;;  %v5715_v14 = vld [vmem:[%s6853_s9 + $0xd8] sm:$0xff] (!%p925_p9)   ;;  %v5719_v18 = vld [vmem:[%s6853_s9 + $0xe0] sm:$0xff] (!%p925_p9)   ;;  %v5723_v22 = vld [vmem:[%s6853_s9 + $0xe8] sm:$0xff] (!%p925_p9)  }
  0x59   : > { %5229 = vmatprep.subr.bf16.mxu0 (!%p925_p9), %v5709_v8  ;;  %v5716_v15 = vld [vmem:[%s6853_s9 + $0x98] sm:$0xff] (!%p925_p9)   ;;  %v5720_v19 = vld [vmem:[%s6853_s9 + $0xa0] sm:$0xff] (!%p925_p9)   ;;  %v5724_v23 = vld [vmem:[%s6853_s9 + $0xa8] sm:$0xff] (!%p925_p9)  }
  0x5a   : > { %5250 = vmatpush3.bf16.msra.mxu1 %v5708_v7  ;;  %s1008_s2 = scalar_select %p1007_p10, %s6270_s0, 1  ;;  %v5725_v24 = vld [vmem:[%s6853_s9 + $0x70] sm:$0xff]   ;;  %v5729_v28 = vld [vmem:[%s6853_s9 + $0x78] sm:$0xff]   ;;  %v5734_v35 = vld [vmem:[%s6853_s9 + $0x140] sm:$0xff]  }
  0x5b   : > { %5251 = vmatprep.subr.bf16.mxu1 %v5711_v10  ;;  %v5726_v25 = vld [vmem:[%s6853_s9 + $0x30] sm:$0xff]   ;;  %v5730_v29 = vld [vmem:[%s6853_s9 + $0x38] sm:$0xff]   ;;  %v5736_v39 = vld [vmem:[%s6853_s9 + $0x100] sm:$0xff]  }
  0x5c   : > { %5230 = vmatpush3.bf16.msra.mxu0 %v5710_v9  ;;  %s5622_s16 = smul.u32 24, %s1008_s2  ;;  %v5727_v26 = vld [vmem:[%s6853_s9 + $0xf0] sm:$0xff]   ;;  %v5731_v30 = vld [vmem:[%s6853_s9 + $0xf8] sm:$0xff]   ;;  %v5737_v41 = vld [vmem:[%s6853_s9 + $0x148] sm:$0xff]   ;;  %s6822_s2 = smov 96  }
  0x5d   : > { %5231 = vmatprep.subr.bf16.mxu0 %v5713_v12  ;;  %v5728_v27 = vld [vmem:[%s6853_s9 + $0xb0] sm:$0xff]   ;;  %v5733_v33 = vld [vmem:[%s6853_s9 + $0xb8] sm:$0xff]   ;;  %v5738_v43 = vld [vmem:[%s6853_s9 + $0x108] sm:$0xff]  }
  0x5e   : > { %5252 = vmatpush3.bf16.msra.mxu1 %v5712_v11  ;;  %s6329_s22 = scalar_lea.vmem %s6858_s5, %s5622_s16  ;;  %v5739_v44 = vld [vmem:[%s6853_s9 + $0x150] sm:$0xff]   ;;  %v5741_v46 = vld [vmem:[%s6853_s9 + $0x158] sm:$0xff]   ;;  %v5743_v48 = vld [vmem:[%s6853_s9 + $0x160] sm:$0xff]   ;;  %s6818_s16 = smov 32  }
  0x5f   : > { %5253 = vmatprep.subr.bf16.mxu1 %v5715_v14  ;;  %v1013_v31 = vld [vmem:[%s6329_s22] sm:$0xff]  ;;  %v1014_v36 = vld [vmem:[%s6329_s22 + $0x8] sm:$0xff]  ;;  %v5740_v45 = vld [vmem:[%s6853_s9 + $0x110] sm:$0xff]   ;;  %s6876_s5 = sld [smem:[#allocation24_spill]] }
  0x60   : > { %5232 = vmatpush3.bf16.msra.mxu0 %v5714_v13  ;;  %v1019_v32 = vcombine.high %v1013_v31, %v1013_v31  ;;  %v1025_v34 = vpack.c.bf16 %v1013_v31, %v1013_v31  ;;  %v1020_v38 = vcombine.high %v1014_v36, %v1014_v36  ;;  %v1027_v40 = vpack.c.bf16 %v1014_v36, %v1014_v36  ;;  %v5742_v47 = vld [vmem:[%s6853_s9 + $0x118] sm:$0xff]   ;;  %v5744_v49 = vld [vmem:[%s6853_s9 + $0x120] sm:$0xff]   ;;  %v1015_v50 = vld [vmem:[%s6329_s22 + $0x10] sm:$0xff]  ;;  %s6861_s22 = sld [smem:[#allocation12_spill]] }
  0x61   : > { %5233 = vmatprep.subr.bf16.mxu0 %v5717_v16  ;;  %v5745_v51 = vld [vmem:[%s6853_s9 + $0x168] sm:$0xff]   ;;  %v1021_v52 = vcombine.high %v1015_v50, %v1015_v50  ;;  %v5747_v55 = vld [vmem:[%s6853_s9 + $0x170] sm:$0xff]   ;;  %v5749_v57 = vld [vmem:[%s6853_s9 + $0x178] sm:$0xff]   ;;  %v1029_v59 = vpack.c.bf16 %v1015_v50, %v1015_v50 }
  0x62   : > { %5254 = vmatpush3.bf16.msra.mxu1 %v5716_v15  ;;  %v1026_v37 = vpack.c.bf16 %v1019_v32, %v1019_v32  ;;  %v1028_v42 = vpack.c.bf16 %v1020_v38, %v1020_v38  ;;  %v5746_v54 = vld [vmem:[%s6853_s9 + $0x128] sm:$0xff]   ;;  %v5748_v56 = vld [vmem:[%s6853_s9 + $0x130] sm:$0xff]   ;;  %v5750_v58 = vld [vmem:[%s6853_s9 + $0x138] sm:$0xff]  }
  0x63   : > { %5255 = vmatprep.subr.bf16.mxu1 %v5719_v18  ;;  %v1030_v53 = vpack.c.bf16 %v1021_v52, %v1021_v52  ;;  %v5752_v60 = vld [vmem:[%s6855_s3] ss:$12 sps:$4 sm:$0xff]   ;;  %v5754_v61 = vld [vmem:[%s6855_s3 + $0x4] ss:$12 sps:$4 sm:$0xff]   ;;  %v5755_v63 = vld [vmem:[%s6855_s3 + $0x8] ss:$12 sps:$4 sm:$0xff]  }
  0x64   : > { %5234 = vmatpush3.bf16.msra.mxu0 %v5718_v17  ;;  %1454 = vmatprep.mubr.bf16.mxu0 %v1026_v37  ;;  %v4961_v1 = vld [vmem:[%s6859_s13] ss:$0 sm:$0xff]  ;;  %v5760_v31 = vld [vmem:[%s6855_s3 + $0x30] ss:$12 sps:$4 sm:$0xff]   ;;  %v5763_v32 = vld [vmem:[%s6855_s3 + $0x38] ss:$12 sps:$4 sm:$0xff]  }
  0x65   : > { %5235 = vmatprep.subr.bf16.mxu0 %v5721_v20  ;;  %1494 = vmatprep.mubr.bf16.mxu1 %v1028_v42  ;;  %v5768_v36 = vld [vmem:[%s6855_s3 + $0x60] ss:$12 sps:$4 sm:$0xff]   ;;  %v5770_v37 = vld [vmem:[%s6855_s3 + $0x64] ss:$12 sps:$4 sm:$0xff]   ;;  %v5771_v38 = vld [vmem:[%s6855_s3 + $0x68] ss:$12 sps:$4 sm:$0xff]  }
  0x66   : > { %5256 = vmatpush3.bf16.msra.mxu1 %v5720_v19  ;;  %v1542_v19 = vld [vmem:[%s6097_s17] sm:$0x1] }
  0x67   : > { %5257 = vmatprep.subr.bf16.mxu1 %v5723_v22  ;;  %v5778_v42 = vld [vmem:[%s6855_s3 + $0x94] ss:$12 sps:$4 sm:$0xff]  }
  0x68   : > { %5236 = vmatpush3.bf16.msra.mxu0 %v5722_v21  ;;  %v1548_v21 = vld [vmem:[%s6102_s21] sm:$0x1f] }
  0x69   : > { %5237 = vmatprep.subr.bf16.mxu0 %v5725_v24 }
  0x6a   : > { %5258 = vmatpush3.bf16.msra.mxu1 %v5724_v23 }
  0x6b   : > { %5259 = vmatprep.subr.bf16.mxu1 %v5727_v26 }
  0x6c   : > { %5238 = vmatpush3.bf16.msra.mxu0 %v5726_v25 }
  0x6d   : > { %5239 = vmatprep.subr.bf16.mxu0 %v5729_v28  ;;  %v5756_v28 = vld [vmem:[%s6855_s3 + $0x18] ss:$12 sps:$4 sm:$0xff]  }
  0x6e   : > { %5260 = vmatpush3.bf16.msra.mxu1 %v5728_v27  ;;  %v5758_v27 = vld [vmem:[%s6855_s3 + $0x1c] ss:$12 sps:$4 sm:$0xff]  }
  0x6f   : > { %5261 = vmatprep.subr.bf16.mxu1 %v5731_v30  ;;  %v5762_v30 = vld [vmem:[%s6855_s3 + $0x34] ss:$12 sps:$4 sm:$0xff]  }
  0x70   : > { %5240 = vmatpush3.bf16.msra.mxu0 %v5730_v29  ;;  %v5759_v29 = vld [vmem:[%s6855_s3 + $0x20] ss:$12 sps:$4 sm:$0xff]  }
  0x71   : > { %5269 = vmatprep.subr.bf16.mxu0 %v5734_v35  ;;  %v5767_v35 = vld [vmem:[%s6855_s3 + $0x50] ss:$12 sps:$4 sm:$0xff]  }
  0x72   : > { %5262 = vmatpush3.bf16.msra.mxu1 %v5733_v33  ;;  %v5766_v33 = vld [vmem:[%s6855_s3 + $0x4c] ss:$12 sps:$4 sm:$0xff]  }
  0x73   : > { %1455 = vmatmul.mubr.bf16.vlgmr.msra.gmra.mrb[0].mxu0 %v1025_v34  ;;  %1761 = vmatprep.subr.bf16.mxu1 %v5754_v61  ;;  %v5764_v34 = vld [vmem:[%s6855_s3 + $0x48] ss:$12 sps:$4 sm:$0xff]  }
  0x74   : > { %5270 = vmatpush3.bf16.msra.mxu0 %v5736_v39  ;;  %1534 = vmatprep.mubr.bf16.mxu0 %v1030_v53  ;;  %v5774_v39 = vld [vmem:[%s6855_s3 + $0x7c] ss:$12 sps:$4 sm:$0xff]  }
  0x75   : > { %1495 = vmatmul.mubr.bf16.vlgmr.msra.gmra.mrb[0].mxu1 %v1027_v40  ;;  %5271 = vmatprep.subr.bf16.mxu0 %v5737_v41  ;;  %v5772_v40 = vld [vmem:[%s6855_s3 + $0x78] ss:$12 sps:$4 sm:$0xff]   ;;  %v5775_v41 = vld [vmem:[%s6855_s3 + $0x80] ss:$12 sps:$4 sm:$0xff]  }
  0x76   : > { %1762 = vmatpush1.bf16.msra.mxu1 %v5752_v60  ;;  %v5011_v60 = vld [vmem:[%s6112_s29] ss:$0 sm:$0xff] }
  0x77   : > { %1763 = vmatprep.subr.bf16.mxu1 %v5758_v27 }
  0x78   : > { %5272 = vmatpush3.bf16.msra.mxu0 %v5738_v43  ;;  %v6068_v43 = vmov 0  }
  0x79   : > { %5273 = vmatprep.subr.bf16.mxu0 %v5739_v44  ;;  %1793 = vmatprep.mubr.bf16.mxu1 %v6068_v43  ;;  %v5776_v44 = vld [vmem:[%s6855_s3 + $0x90] ss:$12 sps:$4 sm:$0xff]  }
  0x7a   : > { %1764 = vmatpush1.bf16.msra.mxu1 %v5756_v28 }
  0x7b   : > { %1765 = vmatprep.subr.bf16.mxu1 %v5762_v30 }
  0x7c   : > { %5274 = vmatpush3.bf16.msra.mxu0 %v5740_v45  ;;  %v5779_v45 = vld [vmem:[%s6855_s3 + $0x98] ss:$12 sps:$4 sm:$0xff]  }
  0x7d   : > { %5275 = vmatprep.subr.bf16.mxu0 %v5741_v46  ;;  %v5782_v46 = vld [vmem:[%s6855_s3 + $0xac] ss:$12 sps:$4 sm:$0xff]  }
  0x7e   : > { %1766 = vmatpush1.bf16.msra.mxu1 %v5760_v31 }
  0x7f   : > { %1767 = vmatprep.subr.bf16.mxu1 %v5766_v33 }
  0x80   : > { %5276 = vmatpush3.bf16.msra.mxu0 %v5742_v47  ;;  %v5780_v47 = vld [vmem:[%s6855_s3 + $0xa8] ss:$12 sps:$4 sm:$0xff]  }
  0x81   : > { %5277 = vmatprep.subr.bf16.mxu0 %v5743_v48  ;;  %v5783_v48 = vld [vmem:[%s6855_s3 + $0xb0] ss:$12 sps:$4 sm:$0xff]   ;;  %s6867_s3 = sld [smem:[#allocation17_spill]] }
  0x82   : > { %1768 = vmatpush1.bf16.msra.mxu1 %v5764_v34 }
  0x83   : > { %1769 = vmatprep.subr.bf16.mxu1 %v5770_v37 }
  0x84   : > { %5278 = vmatpush3.bf16.msra.mxu0 %v5744_v49 }
  0x85   : > { %5279 = vmatprep.subr.bf16.mxu0 %v5745_v51 }
  0x86   : > { %1770 = vmatpush1.bf16.msra.mxu1 %v5768_v36 }
  0x87   : > { %1771 = vmatprep.subr.bf16.mxu1 %v5774_v39 }
  0x88   : > { %5280 = vmatpush3.bf16.msra.mxu0 %v5746_v54 }
  0x89   : > { %5281 = vmatprep.subr.bf16.mxu0 %v5747_v55 }
  0x8a   : > { %1772 = vmatpush1.bf16.msra.mxu1 %v5772_v40 }
  0x8b   : > { %1773 = vmatprep.subr.bf16.mxu1 %v5778_v42 }
  0x8c   : > { %5282 = vmatpush3.bf16.msra.mxu0 %v5748_v56 }
  0x8d   : > { %5283 = vmatprep.subr.bf16.mxu0 %v5749_v57 }
  0x8e   : > { %1774 = vmatpush1.bf16.msra.mxu1 %v5776_v44 }
  0x8f   : > { %1775 = vmatprep.subr.bf16.mxu1 %v5782_v46 }
  0x90   : > { %5284 = vmatpush3.bf16.msra.mxu0 %v5750_v58  ;;  %v5010_v58 = vld [vmem:[%s6107_s25] ss:$0 sm:$0xff] }
  0x91   : > { %5418 = vmatprep.subr.bf16.mxu0 %v6067_v62 }
  0x92   : > { %1776 = vmatpush1.bf16.msra.mxu1 %v5780_v47 }
  0x93   : > { %1535 = vmatmul.mubr.bf16.vlgmr.msra.gmra.mrb[4].mxu0 %v1029_v59  ;;  %5443 = vmatprep.subr.mxu1 %v6067_v62 }
  0x94   : > { %5419 = vmatpush3.bf16.msra.mxu0 %v5755_v63  ;;  %5434 = vmatprep.mubr.msk.bf16.mxu0 %vm6069_vm2, %v6067_v62 }
  0x95   : > { %5420 = vmatprep.subr.bf16.mxu0 %v6067_v62 }
  0x98   : > { %5421 = vmatpush3.bf16.msra.mxu0 %v5759_v29 }
  0x99   : > { %5422 = vmatprep.subr.bf16.mxu0 %v6067_v62 }
  0x9c   : > { %5423 = vmatpush3.bf16.msra.mxu0 %v5763_v32 }
  0x9d   : > { %5424 = vmatprep.subr.bf16.mxu0 %v6067_v62 }
  0xa0   : > { %5425 = vmatpush3.bf16.msra.mxu0 %v5767_v35 }
  0xa1   : > { %5426 = vmatprep.subr.bf16.mxu0 %v6067_v62 }
  0xa4   : > { %5427 = vmatpush3.bf16.msra.mxu0 %v5771_v38 }
  0xa5   : > { %5428 = vmatprep.subr.bf16.mxu0 %v6067_v62 }
  0xa8   : > { %5429 = vmatpush3.bf16.msra.mxu0 %v5775_v41 }
  0xa9   : > { %5430 = vmatprep.subr.bf16.mxu0 %v6067_v62 }
  0xac   : > { %5431 = vmatpush3.bf16.msra.mxu0 %v5779_v45 }
  0xad   : > { %5432 = vmatprep.subr.bf16.mxu0 %v6067_v62 }
  0xb0   : > { %5433 = vmatpush3.bf16.msra.mxu0 %v5783_v48 }
  0xb1   : > { %5438 = vmatprep.subr.mxu0 %v6067_v62 }
 0x146   : > { %v5241_v0 = vpop.f32.mrb[0].mxu0 }
 0x147   : > { %v5242_v2 = vpop.f32.mrb[1].mxu0 }
 0x148   : > { %v5243_v3 = vadd.f32 %v5242_v2, %v5241_v0  ;;  %v5244_v4 = vpop.f32.mrb[2].mxu0  ;;  %v5263_v5 = vpop.f32.mrb[0].mxu1 }
 0x149   : > { %v5245_v6 = vpop.f32.mrb[3].mxu0  ;;  %v5264_v7 = vpop.f32.mrb[1].mxu1  ;;  %v1616_v4 = vld [vmem:[%s6860_s8] sm:$0x7] }
 0x14a   : > { %v1457_v8 = vadd.f32 %v5243_v3, %v4961_v1  ;;  %v5265_v9 = vadd.f32 %v5264_v7, %v5263_v5  ;;  %v5266_v10 = vpop.f32.mrb[2].mxu1  ;;  %v1618_v1 = vlaneseq }
 0x14b   : > { %v5267_v11 = vpop.f32.mrb[3].mxu1 }
 0x14c   : > { %v1497_v12 = vadd.f32 %v5265_v9, %v1457_v8  ;;  %v6408_v2 = vshrl.u32 %v1618_v1, 7 }
 0x14e   : > { %v6411_v3 = vsub.s32 1, %v6408_v2  ;;  %v6415_v5 = vsub.s32 0, %v6408_v2 }
 0x150   : > { %v1625_v6 = vrot.slane %v1616_v4, %v6411_v3  ;;  %v1621_v11 = vrot.slane %v1616_v4, %v6415_v5 }
 0x166   : > { %v5285_v13 = vpop.f32.mrb[4].mxu0 }
 0x167   : > { %v5286_v14 = vpop.f32.mrb[5].mxu0 }
 0x168   : > { %v5287_v15 = vadd.f32 %v5286_v14, %v5285_v13  ;;  %v5288_v16 = vpop.f32.mrb[6].mxu0 }
 0x169   : > { %v5289_v17 = vpop.f32.mrb[7].mxu0 }
 0x16a   : > { %v1537_v18 = vadd.f32 %v5287_v15, %v1497_v12 }
 0x16c   : > { %v1544_v20 = vrot.slane %v1537_v18, 7 }
 0x16e   : > { %v1547_v22 = vsel %vm1546_vm0, %v1542_v19, %v1544_v20 }
 0x16f   : > { %v6362_v23 = vadd.f32 %v1548_v21, %v1547_v22  ;;  %v1628_v21 = vsub.s32 2, %v6408_v2 }
 0x171   : > { %v1553_v24 = vsel %vm1552_vm1, %v6362_v23, 0.0  ;;  %v1558_v25 = vmul.f32 %v6362_v23, %v6362_v23 }
 0x172   : > { %1554 = vadd.xlane.f32.xlu0 %v1553_v24  ;;  %v1629_v24 = vrot.slane %v1616_v4, %v1628_v21 }
 0x173   : > { %v1559_v26 = vsel %vm1552_vm1, %v1558_v25, 0.0 }
 0x176   : > { %1560 = vadd.xlane.f32.xlu0 %v1559_v26 }
 0x1ff   : > { %v1555_v49 = vpop.xlane.xlu0 %1554 }
 0x200   : > { %v1557_v50 = vmul.f32 0.0078125, %v1555_v49 }
 0x202   : > { %v1563_v52 = vmul.f32 %v1557_v50, %v1557_v50  ;;  %v1565_v56 = vsub.f32 %v6362_v23, %v1557_v50 }
 0x203   : > { %v1561_v51 = vpop.xlane.xlu0 %1560 }
 0x204   : > { %v1562_v53 = vmul.f32 0.0078125, %v1561_v51 }
 0x206   : > { %v1564_v54 = vsub.f32 %v1562_v53, %v1563_v52 }
 0x208   : > { %v1566_v55 = vadd.f32 1e-06, %v1564_v54 }
 0x20a   : > { %5920 = vrsqrt.f32 %v1566_v55 }
 0x214   : > { %v5921_v57 = vpop.eup %5920 }
 0x215   : > { %v1568_v59 = vmul.f32 %v5921_v57, %v1565_v56 }
 0x217   : > { %v1575_v61 = vmul.f32 %v5010_v58, %v1568_v59 }
 0x219   : > { %v1582_v63 = vadd.f32 %v5011_v60, %v1575_v61 }
 0x21b   : > { %v1583_v0 = vpack.c.bf16 %v1582_v63, %v1582_v63 }
 0x21d   : > { %1794 = vmatmul.mubr.bf16.vlgmr.msra.gmra.mrb[4].mxu1 %v1583_v0  ;;  %5435 = vmatmul.mubr.bf16.vlgmr.msra.gmra.mrb[8].mxu0 %v1583_v0 }
 0x21e   : > { %5440 = vmatprep.mubr.msk.f32.mxu0 %vm6069_vm2, %v6067_v62  ;;  %5445 = vmatprep.mubr.msk.f32.mxu1 %vm6069_vm2, %v6067_v62 }
 0x2f0   : > { %v1795_v7 = vpop.f32.mrb[4].mxu1  ;;  %v1836_v8 = vpop.f32.mrb[8].mxu0 }
 0x2f1   : > { %v1797_v9 = vpop.f32.mrb[5].mxu1  ;;  %v5436_v10 = vpop.f32.mrb[9].mxu0  ;;  %v1796_v17 = vadd.f32 %v1795_v7, %v1621_v11  ;;  %v6445_v26 = vadd.f32 %v1836_v8, %v1629_v24  ;;  %v5784_v8 = vld [vmem:[%s6127_s14] sm:$0xff]   ;;  %v5790_v24 = vld [vmem:[%s6127_s14 + $0x30] sm:$0xff]  }
 0x2f2   : > { %v1798_v12 = vadd.f32 %v1797_v9, %v1625_v6  ;;  %v1799_v13 = vpop.f32.mrb[6].mxu1  ;;  %v1839_v14 = vpop.f32.mrb[10].mxu0  ;;  %v5785_v9 = vld [vmem:[%s6127_s14 + $0x8] sm:$0xff]  }
 0x2f3   : > { %v1800_v15 = vpop.f32.mrb[7].mxu1  ;;  %v5437_v16 = vpop.f32.mrb[11].mxu0 }
 0x2f4   : > { %1852 = vrot.lane.b32.xlu0 %v1798_v12, %s6820_s23  ;;  %1850 = vrot.lane.b32.xlu1 %v1798_v12, %s6822_s2 }
 0x2f5   : > { %5439 = vmatpush3.xpose.msk.msra.mxu0 %vm1863_vm3, %v1798_v12 }
 0x2f6   : > { %5478 = vmatprep.subr.bf16.mxu0 %v6067_v62 }
 0x2f8   : > { %5441 = vmatmul.mubr.msk.f32.vlgmr.msra.gmra.mrb[12].mxu0 %vm1863_vm3, %v1796_v17  ;;  %1843 = vrot.lane.b32.xlu1 %v1796_v17, %s6822_s2 }
 0x2f9   : > { %5482 = vmatprep.mubr.msk.bf16.mxu0 %vm6069_vm2, %v6067_v62  ;;  %5479 = vmatpush3.bf16.msra.mxu0 %v5784_v8 }
 0x2fa   : > { %5480 = vmatprep.subr.bf16.mxu0 %v6067_v62 }
 0x2fc   : > { %1845 = vrot.lane.b32.xlu1 %v1796_v17, %s6820_s23 }
 0x2fd   : > { %5481 = vmatpush3.bf16.msra.mxu0 %v5785_v9 }
 0x2fe   : > { %5486 = vmatprep.subr.bf16.mxu0 %v6067_v62 }
 0x300   : > { %1854 = vrot.lane.b32.xlu1 %v1798_v12, %s6818_s16 }
 0x304   : > { %1847 = vrot.lane.b32.xlu1 %v1796_v17, %s6818_s16 }
 0x366   : > { %v1851_v18 = vpop.permute.xlu1 %1850  ;;  %v1853_v20 = vpop.permute.xlu0 %1852 }
 0x367   : > { %5444 = vmatpush3.xpose.msk.msra.mxu1 %vm1863_vm3, %v1851_v18 }
 0x368   : > { %5448 = vmatprep.subr.mxu1 %v6067_v62 }
 0x36a   : > { %v1844_v19 = vpop.permute.xlu1 %1843 }
 0x36b   : > { %5446 = vmatmul.mubr.msk.f32.vlgmr.msra.gmra.mrb[8].mxu1 %vm1863_vm3, %v1844_v19 }
 0x36c   : > { %5449 = vmatpush3.xpose.msk.msra.mxu1 %vm1863_vm3, %v1853_v20  ;;  %5450 = vmatprep.mubr.msk.f32.mxu1 %vm6069_vm2, %v6067_v62 }
 0x36d   : > { %5453 = vmatprep.subr.mxu1 %v6067_v62 }
 0x36e   : > { %v1846_v22 = vpop.permute.xlu1 %1845 }
 0x36f   : > { %5451 = vmatmul.mubr.msk.f32.vlgmr.msra.gmra.mrb[10].mxu1 %vm1863_vm3, %v1846_v22 }
 0x370   : > { %5455 = vmatprep.mubr.msk.f32.mxu1 %vm6069_vm2, %v6067_v62 }
 0x372   : > { %v1855_v25 = vpop.permute.xlu1 %1854 }
 0x373   : > { %5454 = vmatpush3.xpose.msk.msra.mxu1 %vm1863_vm3, %v1855_v25 }
 0x374   : > { %5458 = vmatprep.subr.mxu1 %v6067_v62 }
 0x376   : > { %v1848_v27 = vpop.permute.xlu1 %1847 }
 0x377   : > { %5456 = vmatmul.mubr.msk.f32.vlgmr.msra.gmra.mrb[12].mxu1 %vm1863_vm3, %v1848_v27 }
 0x378   : > { %5459 = vmatpush3.msk.msra.mxu1 %vm1552_vm1, %v6445_v26  ;;  %5460 = vmatprep.mubr.msk.f32.mxu1 %vm6069_vm2, %v6067_v62 }
 0x379   : > { %5463 = vmatprep.subr.mxu1 %v6067_v62 }
 0x3cb   : > { %v1934_v28 = vpop.f32.mrb[12].mxu0 }
 0x3cc   : > { %v2160_v29 = vmul.f32 0.17677669, %v1934_v28  ;;  %v5442_v30 = vpop.f32.mrb[13].mxu0 }
 0x3cd   : > { %v5791_v30 = vld [vmem:[%s6127_s14 + $0x38] sm:$0xff]  }
 0x3ce   : > { %v2165_v31 = vsel %vm2164_vm4, %v2160_v29, -inf }
 0x3cf   : > { %2166 = vmax.xlane.f32.xlu1 %v2165_v31 }
 0x43e   : > { %v2008_v32 = vpop.f32.mrb[8].mxu1 }
 0x43f   : > { %v2161_v33 = vmul.f32 0.17677669, %v2008_v32  ;;  %v5447_v34 = vpop.f32.mrb[9].mxu1  ;;  %v5788_v32 = vld [vmem:[%s6127_s14 + $0x20] sm:$0xff]  }
 0x441   : > { %v2168_v35 = vsel %vm2164_vm4, %v2161_v33, -inf }
 0x442   : > { %2169 = vmax.xlane.f32.xlu0 %v2168_v35  ;;  %v2082_v36 = vpop.f32.mrb[10].mxu1 }
 0x443   : > { %v2162_v37 = vmul.f32 0.17677669, %v2082_v36  ;;  %v5452_v38 = vpop.f32.mrb[11].mxu1  ;;  %v5789_v36 = vld [vmem:[%s6127_s14 + $0x28] sm:$0xff]  }
 0x445   : > { %v2171_v39 = vsel %vm2164_vm4, %v2162_v37, -inf }
 0x446   : > { %2172 = vmax.xlane.f32.xlu1 %v2171_v39 }
 0x44a   : > { %v2156_v40 = vpop.f32.mrb[12].mxu1 }
 0x44b   : > { %v2163_v41 = vmul.f32 0.17677669, %v2156_v40  ;;  %v5457_v42 = vpop.f32.mrb[13].mxu1 }
 0x44d   : > { %v2174_v44 = vsel %vm2164_vm4, %v2163_v41, -inf }
 0x44e   : > { %2175 = vmax.xlane.f32.xlu1 %v2174_v44 }
 0x45c   : > { %v2167_v45 = vpop.xlane.xlu1 %2166 }
 0x45d   : > { %v2177_v46 = vsub.f32 %v2160_v29, %v2167_v45  ;;  %v5787_v29 = vld [vmem:[%s6127_s14 + $0x18] sm:$0xff]  }
 0x45f   : > { %v2181_v47 = vmul.f32 1.442695, %v2177_v46 }
 0x461   : > { %5922 = vpow2.f32 %v2181_v47  ;;  %v5792_v47 = vld [vmem:[%s6854_s6] ss:$8 sps:$4 sm:$0xff]  }
 0x46b   : > { %v5923_v48 = vpop.eup %5922 }
 0x46c   : > { %v2189_v49 = vsel %vm2164_vm4, %v5923_v48, 0.0 }
 0x46d   : > { %2190 = vadd.xlane.f32.xlu0 %v2189_v49  ;;  %v5797_v49 = vld [vmem:[%s6854_s6 + $0x14] ss:$8 sps:$4 sm:$0xff]  }
 0x4cf   : > { %v2170_v50 = vpop.xlane.xlu0 %2169 }
 0x4d0   : > { %v2178_v51 = vsub.f32 %v2161_v33, %v2170_v50  ;;  %v5795_v50 = vld [vmem:[%s6854_s6 + $0x10] ss:$8 sps:$4 sm:$0xff]  }
 0x4d2   : > { %v2183_v52 = vmul.f32 1.442695, %v2178_v51  ;;  %v5055_v51 = vld [vmem:[%s6132_s19] ss:$0 sm:$0xff] }
 0x4d3   : > { %v2173_v53 = vpop.xlane.xlu1 %2172 }
 0x4d4   : > { %5924 = vpow2.f32 %v2183_v52  ;;  %v2179_v54 = vsub.f32 %v2162_v37, %v2173_v53 }
 0x4d6   : > { %v2185_v55 = vmul.f32 1.442695, %v2179_v54 }
 0x4d8   : > { %5926 = vpow2.f32 %v2185_v55 }
 0x4db   : > { %v2176_v61 = vpop.xlane.xlu1 %2175 }
 0x4dc   : > { %v2180_v63 = vsub.f32 %v2163_v41, %v2176_v61 }
 0x4de   : > { %v5925_v56 = vpop.eup %5924  ;;  %v2187_v0 = vmul.f32 1.442695, %v2180_v63 }
 0x4df   : > { %v2192_v57 = vsel %vm2164_vm4, %v5925_v56, 0.0 }
 0x4e0   : > { %2193 = vadd.xlane.f32.xlu1 %v2192_v57 }
 0x4e2   : > { %v5927_v58 = vpop.eup %5926 }
 0x4e3   : > { %v2195_v59 = vsel %vm2164_vm4, %v5927_v58, 0.0 }
 0x4e4   : > { %2196 = vadd.xlane.f32.xlu0 %v2195_v59 }
 0x4f1   : > { %1859 = vrot.lane.b32.xlu1 %v6445_v26, %s6820_s23  ;;  %s6864_s23 = sld [smem:[#allocation13_spill]] }
 0x4fa   : > { %v2191_v60 = vpop.xlane.xlu0 %2190  ;;  %1857 = vrot.lane.b32.xlu0 %v6445_v26, %s6822_s2  ;;  %s6866_s2 = sld [smem:[#allocation15_spill]] }
 0x4fb   : > { %5928 = vrcp.f32 %v2191_v60 }
 0x4fc   : > { %5930 = vpow2.f32 %v2187_v0 }
 0x505   : > { %v5929_v1 = vpop.eup %5928 }
 0x506   : > { %v2205_v4 = vmul.f32 %v5929_v1, %v5923_v48  ;;  %v5931_v6 = vpop.eup %5930  ;;  %v5794_v48 = vld [vmem:[%s6854_s6 + $0x4] ss:$8 sps:$4 sm:$0xff]  }
 0x507   : > { %v2198_v7 = vsel %vm2164_vm4, %v5931_v6, 0.0 }
 0x508   : > { %5461 = vmatmul.mubr.msk.f32.vlgmr.msra.gmra.mrb[14].mxu1 %vm2209_vm5, %v2205_v4 }
 0x509   : > { %5465 = vmatprep.mubr.msk.f32.mxu1 %vm6069_vm2, %v6067_v62 }
 0x515   : > { %2199 = vadd.xlane.f32.xlu1 %v2198_v7 }
 0x526   : > { %1861 = vrot.lane.b32.xlu1 %v6445_v26, %s6818_s16  ;;  %v5786_v26 = vld [vmem:[%s6127_s14 + $0x10] sm:$0xff]   ;;  %s6862_s16 = sld [smem:[#allocation11_spill]] }
 0x56d   : > { %v2194_v10 = vpop.xlane.xlu1 %2193 }
 0x56e   : > { %5932 = vrcp.f32 %v2194_v10 }
 0x571   : > { %v2197_v11 = vpop.xlane.xlu0 %2196  ;;  %v1860_v15 = vpop.permute.xlu1 %1859 }
 0x572   : > { %5934 = vrcp.f32 %v2197_v11 }
 0x575   : > { %v1858_v12 = vpop.permute.xlu0 %1857 }
 0x576   : > { %5464 = vmatpush3.msk.msra.mxu1 %vm1552_vm1, %v1858_v12  ;;  %v5800_v12 = vld [vmem:[%s6854_s6 + $0x24] ss:$8 sps:$4 sm:$0xff]  }
 0x577   : > { %5468 = vmatprep.subr.mxu1 %v6067_v62 }
 0x578   : > { %v5933_v13 = vpop.eup %5932 }
 0x579   : > { %v2206_v14 = vmul.f32 %v5933_v13, %v5925_v56  ;;  %v5798_v13 = vld [vmem:[%s6854_s6 + $0x20] ss:$8 sps:$4 sm:$0xff]  }
 0x57b   : > { %5466 = vmatmul.mubr.msk.f32.vlgmr.msra.gmra.mrb[16].mxu1 %vm2209_vm5, %v2206_v14  ;;  %v5801_v14 = vld [vmem:[%s6854_s6 + $0x30] ss:$8 sps:$4 sm:$0xff]  }
 0x57c   : > { %v5935_v16 = vpop.eup %5934  ;;  %5469 = vmatpush3.msk.msra.mxu1 %vm1552_vm1, %v1860_v15  ;;  %5470 = vmatprep.mubr.msk.f32.mxu1 %vm6069_vm2, %v6067_v62  ;;  %v5806_v15 = vld [vmem:[%s6854_s6 + $0x44] ss:$8 sps:$4 sm:$0xff]  }
 0x57d   : > { %v2207_v17 = vmul.f32 %v5935_v16, %v5927_v58  ;;  %5473 = vmatprep.subr.mxu1 %v6067_v62  ;;  %v5804_v16 = vld [vmem:[%s6854_s6 + $0x40] ss:$8 sps:$4 sm:$0xff]  }
 0x57f   : > { %5471 = vmatmul.mubr.msk.f32.vlgmr.msra.gmra.mrb[18].mxu1 %vm2209_vm5, %v2207_v17  ;;  %v5809_v17 = vld [vmem:[%s6854_s6 + $0x54] ss:$8 sps:$4 sm:$0xff]  }
 0x580   : > { %5475 = vmatprep.mubr.msk.f32.mxu1 %vm6069_vm2, %v6067_v62 }
 0x5a2   : > { %v2200_v18 = vpop.xlane.xlu1 %2199 }
 0x5a3   : > { %5936 = vrcp.f32 %v2200_v18  ;;  %v5807_v18 = vld [vmem:[%s6854_s6 + $0x50] ss:$8 sps:$4 sm:$0xff]  }
 0x5a6   : > { %v1862_v19 = vpop.permute.xlu1 %1861 }
 0x5a7   : > { %5474 = vmatpush3.msk.msra.mxu1 %vm1552_vm1, %v1862_v19  ;;  %v5812_v19 = vld [vmem:[%s6854_s6 + $0x64] ss:$8 sps:$4 sm:$0xff]  }
 0x5a8   : > { %5502 = vmatprep.subr.bf16.mxu1 %v6067_v62 }
 0x5ad   : > { %v5937_v20 = vpop.eup %5936 }
 0x5ae   : > { %v2208_v22 = vmul.f32 %v5937_v20, %v5931_v6  ;;  %v5810_v20 = vld [vmem:[%s6854_s6 + $0x60] ss:$8 sps:$4 sm:$0xff]  }
 0x5b0   : > { %5476 = vmatmul.mubr.msk.f32.vlgmr.msra.gmra.mrb[20].mxu1 %vm2209_vm5, %v2208_v22  ;;  %v5815_v22 = vld [vmem:[%s6854_s6 + $0x74] ss:$8 sps:$4 sm:$0xff]  }
 0x5b1   : > { %5506 = vmatprep.mubr.msk.bf16.mxu1 %vm6069_vm2, %v6067_v62  ;;  %5503 = vmatpush3.bf16.msra.mxu1 %v5790_v24  ;;  %v5813_v24 = vld [vmem:[%s6854_s6 + $0x70] ss:$8 sps:$4 sm:$0xff]  }
 0x5b2   : > { %5504 = vmatprep.subr.bf16.mxu1 %v6067_v62 }
 0x5b5   : > { %5505 = vmatpush3.bf16.msra.mxu1 %v5791_v30 }
 0x5db   : > { %v2281_v25 = vpop.f32.mrb[14].mxu1 }
 0x5dc   : > { %v2511_v27 = vpack.c.bf16 %v2281_v25, %v2281_v25  ;;  %v5462_v28 = vpop.f32.mrb[15].mxu1 }
 0x5de   : > { %5483 = vmatmul.mubr.msk.bf16.vlgmr.msra.gmra.mrb[16].mxu0 %vm1863_vm3, %v2511_v27 }
 0x5df   : > { %5487 = vmatpush3.bf16.msra.mxu0 %v5786_v26  ;;  %5490 = vmatprep.mubr.msk.bf16.mxu0 %vm6069_vm2, %v6067_v62 }
 0x5e0   : > { %5488 = vmatprep.subr.bf16.mxu0 %v6067_v62 }
 0x5e3   : > { %5489 = vmatpush3.bf16.msra.mxu0 %v5787_v29 }
 0x5e4   : > { %5494 = vmatprep.subr.bf16.mxu0 %v6067_v62 }
 0x64e   : > { %v2356_v31 = vpop.f32.mrb[16].mxu1 }
 0x64f   : > { %v2578_v33 = vpack.c.bf16 %v2356_v31, %v2356_v31  ;;  %v5467_v34 = vpop.f32.mrb[17].mxu1 }
 0x650   : > { %v5077_v34 = vld [vmem:[%s6137_s24] ss:$0 sm:$0xff] }
 0x651   : > { %5491 = vmatmul.mubr.msk.bf16.vlgmr.msra.gmra.mrb[20].mxu0 %vm1863_vm3, %v2578_v33 }
 0x652   : > { %v2431_v35 = vpop.f32.mrb[18].mxu1  ;;  %5495 = vmatpush3.bf16.msra.mxu0 %v5788_v32  ;;  %5498 = vmatprep.mubr.msk.bf16.mxu0 %vm6069_vm2, %v6067_v62 }
 0x653   : > { %v5472_v37 = vpop.f32.mrb[19].mxu1  ;;  %5496 = vmatprep.subr.bf16.mxu0 %v6067_v62  ;;  %v2640_v38 = vpack.c.bf16 %v2431_v35, %v2431_v35 }
 0x656   : > { %5497 = vmatpush3.bf16.msra.mxu0 %v5789_v36  ;;  %v5078_v36 = vld [vmem:[%s6142_s30] ss:$0 sm:$0xff] }
 0x657   : > { %2905 = vmatprep.subr.bf16.mxu0 %v5794_v48  ;;  %v5823_v48 = vld [vmem:[%s6861_s22 + $0x18] sm:$0xff]  }
 0x659   : > { %5499 = vmatmul.mubr.msk.bf16.vlgmr.msra.gmra.mrb[24].mxu0 %vm1863_vm3, %v2640_v38 }
 0x65a   : > { %2937 = vmatprep.mubr.bf16.mxu0 %v6068_v43  ;;  %2906 = vmatpush1.bf16.msra.mxu0 %v5792_v47  ;;  %v5822_v47 = vld [vmem:[%s6861_s22 + $0x58] sm:$0xff]  }
 0x65b   : > { %2907 = vmatprep.subr.bf16.mxu0 %v5797_v49  ;;  %v5824_v49 = vld [vmem:[%s6861_s22 + $0x60] sm:$0xff]  }
 0x65e   : > { %2908 = vmatpush1.bf16.msra.mxu0 %v5795_v50  ;;  %v5825_v50 = vld [vmem:[%s6861_s22 + $0x20] sm:$0xff]  }
 0x65f   : > { %2909 = vmatprep.subr.bf16.mxu0 %v5800_v12 }
 0x662   : > { %2910 = vmatpush1.bf16.msra.mxu0 %v5798_v13 }
 0x683   : > { %v2506_v39 = vpop.f32.mrb[20].mxu1 }
 0x684   : > { %v2702_v40 = vpack.c.bf16 %v2506_v39, %v2506_v39  ;;  %v5477_v41 = vpop.f32.mrb[21].mxu1 }
 0x685   : > { %v5817_v41 = vld [vmem:[%s6861_s22] sm:$0xff]  }
 0x686   : > { %5507 = vmatmul.mubr.msk.bf16.vlgmr.msra.gmra.mrb[24].mxu1 %vm1863_vm3, %v2702_v40  ;;  %v5816_v40 = vld [vmem:[%s6861_s22 + $0x40] sm:$0xff]  }
 0x687   : > { %5328 = vmatprep.subr.bf16.mxu1 %v5816_v40 }
 0x688   : > { %5329 = vmatpush3.bf16.msra.mxu1 %v5817_v41 }
 0x6b1   : > { %v2565_v42 = vpop.f32.mrb[16].mxu0 }
 0x6b2   : > { %v5484_v44 = vpop.f32.mrb[17].mxu0  ;;  %v2577_v52 = vadd.f32 %v5055_v51, %v2565_v42  ;;  %v5818_v42 = vld [vmem:[%s6861_s22 + $0x48] sm:$0xff]  }
 0x6b3   : > { %v2568_v45 = vpop.f32.mrb[18].mxu0  ;;  %v5819_v44 = vld [vmem:[%s6861_s22 + $0x8] sm:$0xff]   ;;  %5330 = vmatprep.subr.bf16.mxu1 %v5818_v42 }
 0x6b4   : > { %v5485_v46 = vpop.f32.mrb[19].mxu0  ;;  %5331 = vmatpush3.bf16.msra.mxu1 %v5819_v44  ;;  %v5820_v45 = vld [vmem:[%s6861_s22 + $0x50] sm:$0xff]   ;;  %v5826_v51 = vld [vmem:[%s6861_s22 + $0x68] sm:$0xff]  }
 0x6b5   : > { %v5821_v46 = vld [vmem:[%s6861_s22 + $0x10] sm:$0xff]   ;;  %5332 = vmatprep.subr.bf16.mxu1 %v5820_v45 }
 0x6b8   : > { %5333 = vmatpush3.bf16.msra.mxu1 %v5821_v46 }
 0x6b9   : > { %5334 = vmatprep.subr.bf16.mxu1 %v5822_v47 }
 0x6bc   : > { %5335 = vmatpush3.bf16.msra.mxu1 %v5823_v48 }
 0x6bd   : > { %5336 = vmatprep.subr.bf16.mxu1 %v5824_v49 }
 0x6c0   : > { %5337 = vmatpush3.bf16.msra.mxu1 %v5825_v50 }
 0x6c1   : > { %5338 = vmatprep.subr.bf16.mxu1 %v5826_v51 }
 0x724   : > { %v2633_v53 = vpop.f32.mrb[20].mxu0 }
 0x725   : > { %v2639_v54 = vadd.f32 %v2633_v53, %v2577_v52  ;;  %v5492_v55 = vpop.f32.mrb[21].mxu0  ;;  %v5827_v52 = vld [vmem:[%s6861_s22 + $0x28] sm:$0xff]   ;;  %v5828_v53 = vld [vmem:[%s6861_s22 + $0x70] sm:$0xff]  }
 0x726   : > { %v2636_v56 = vpop.f32.mrb[22].mxu0  ;;  %5339 = vmatpush3.bf16.msra.mxu1 %v5827_v52  ;;  %v5830_v55 = vld [vmem:[%s6861_s22 + $0x78] sm:$0xff]  }
 0x727   : > { %v5493_v57 = vpop.f32.mrb[23].mxu0  ;;  %5340 = vmatprep.subr.bf16.mxu1 %v5828_v53  ;;  %v5831_v56 = vld [vmem:[%s6861_s22 + $0x38] sm:$0xff]  }
 0x728   : > { %v2813_v57 = vld [vmem:[%s6862_s16] sm:$0x3]  ;;  %s6863_s16 = sld [smem:[#allocation16_spill]] }
 0x72c   : > { %v2695_v58 = vpop.f32.mrb[24].mxu0 }
 0x72d   : > { %v2701_v59 = vadd.f32 %v2695_v58, %v2639_v54  ;;  %v5500_v60 = vpop.f32.mrb[25].mxu0  ;;  %v5829_v54 = vld [vmem:[%s6861_s22 + $0x30] sm:$0xff]   ;;  %v2818_v58 = vrot.slane %v2813_v57, %v6415_v5 }
 0x72e   : > { %v2698_v61 = vpop.f32.mrb[26].mxu0  ;;  %5341 = vmatpush3.bf16.msra.mxu1 %v5829_v54  ;;  %v5838_v42 = vld [vmem:[%s6863_s16 + $0x1c] ss:$12 sps:$4 sm:$0xff]   ;;  %v5836_v44 = vld [vmem:[%s6863_s16 + $0x18] ss:$12 sps:$4 sm:$0xff]  }
 0x72f   : > { %v5501_v63 = vpop.f32.mrb[27].mxu0  ;;  %5342 = vmatprep.subr.bf16.mxu1 %v5830_v55  ;;  %v5839_v45 = vld [vmem:[%s6863_s16 + $0x20] ss:$12 sps:$4 sm:$0xff]   ;;  %v5840_v46 = vld [vmem:[%s6863_s16 + $0x30] ss:$12 sps:$4 sm:$0xff]  }
 0x730   : > { %v5843_v47 = vld [vmem:[%s6863_s16 + $0x38] ss:$12 sps:$4 sm:$0xff]   ;;  %v5844_v49 = vld [vmem:[%s6863_s16 + $0x48] ss:$12 sps:$4 sm:$0xff]   ;;  %v5847_v50 = vld [vmem:[%s6863_s16 + $0x50] ss:$12 sps:$4 sm:$0xff]  }
 0x731   : > { %v5846_v48 = vld [vmem:[%s6863_s16 + $0x4c] ss:$12 sps:$4 sm:$0xff]   ;;  %v5850_v51 = vld [vmem:[%s6863_s16 + $0x64] ss:$12 sps:$4 sm:$0xff]   ;;  %v5851_v53 = vld [vmem:[%s6863_s16 + $0x68] ss:$12 sps:$4 sm:$0xff]  }
 0x732   : > { %5343 = vmatpush3.bf16.msra.mxu1 %v5831_v56  ;;  %v5848_v52 = vld [vmem:[%s6863_s16 + $0x60] ss:$12 sps:$4 sm:$0xff]   ;;  %v5854_v54 = vld [vmem:[%s6863_s16 + $0x7c] ss:$12 sps:$4 sm:$0xff]   ;;  %v5852_v55 = vld [vmem:[%s6863_s16 + $0x78] ss:$12 sps:$4 sm:$0xff]  }
 0x733   : > { %5510 = vmatprep.subr.bf16.mxu1 %v6067_v62  ;;  %v5855_v56 = vld [vmem:[%s6863_s16 + $0x80] ss:$12 sps:$4 sm:$0xff]  }
 0x759   : > { %v2757_v0 = vpop.f32.mrb[24].mxu1 }
 0x75a   : > { %v2763_v1 = vadd.f32 %v2757_v0, %v2701_v59  ;;  %v5508_v4 = vpop.f32.mrb[25].mxu1  ;;  %v2822_v59 = vrot.slane %v2813_v57, %v6411_v3  ;;  %v5858_v57 = vld [vmem:[%s6863_s16 + $0x94] ss:$12 sps:$4 sm:$0xff]  }
 0x75b   : > { %v2760_v6 = vpop.f32.mrb[26].mxu1 }
 0x75c   : > { %v6514_v7 = vadd.f32 %v2763_v1, %v6362_v23  ;;  %v5509_v8 = vpop.f32.mrb[27].mxu1  ;;  %v5803_v23 = vld [vmem:[%s6854_s6 + $0x34] ss:$8 sps:$4 sm:$0xff]  }
 0x75d   : > { %2911 = vmatprep.subr.bf16.mxu0 %v5803_v23 }
 0x75e   : > { %v2767_v9 = vsel %vm1552_vm1, %v6514_v7, 0.0  ;;  %v2771_v10 = vmul.f32 %v6514_v7, %v6514_v7  ;;  %2912 = vmatpush1.bf16.msra.mxu0 %v5801_v14 }
 0x75f   : > { %2768 = vadd.xlane.f32.xlu0 %v2767_v9  ;;  %2913 = vmatprep.subr.bf16.mxu0 %v5806_v15 }
 0x760   : > { %v2772_v11 = vsel %vm1552_vm1, %v2771_v10, 0.0 }
 0x761   : > { %2773 = vadd.xlane.f32.xlu1 %v2772_v11 }
 0x762   : > { %2914 = vmatpush1.bf16.msra.mxu0 %v5804_v16 }
 0x763   : > { %2915 = vmatprep.subr.bf16.mxu0 %v5809_v17 }
 0x766   : > { %2916 = vmatpush1.bf16.msra.mxu0 %v5807_v18 }
 0x767   : > { %2917 = vmatprep.subr.bf16.mxu0 %v5812_v19 }
 0x76a   : > { %2918 = vmatpush1.bf16.msra.mxu0 %v5810_v20 }
 0x76b   : > { %2919 = vmatprep.subr.bf16.mxu0 %v5815_v22 }
 0x76e   : > { %2920 = vmatpush1.bf16.msra.mxu0 %v5813_v24 }
 0x7ec   : > { %v2769_v25 = vpop.xlane.xlu0 %2768 }
 0x7ed   : > { %v2770_v26 = vmul.f32 0.0078125, %v2769_v25 }
 0x7ee   : > { %v2774_v27 = vpop.xlane.xlu1 %2773 }
 0x7ef   : > { %v2776_v28 = vmul.f32 %v2770_v26, %v2770_v26  ;;  %v2775_v29 = vmul.f32 0.0078125, %v2774_v27  ;;  %v2778_v32 = vsub.f32 %v6514_v7, %v2770_v26 }
 0x7f1   : > { %v2777_v30 = vsub.f32 %v2775_v29, %v2776_v28  ;;  %v5832_v28 = vld [vmem:[%s6863_s16] ss:$12 sps:$4 sm:$0xff]   ;;  %v5834_v29 = vld [vmem:[%s6863_s16 + $0x4] ss:$12 sps:$4 sm:$0xff]  }
 0x7f2   : > { %3351 = vmatprep.subr.bf16.mxu0 %v5834_v29 }
 0x7f3   : > { %v2779_v31 = vadd.f32 1e-06, %v2777_v30  ;;  %v5835_v30 = vld [vmem:[%s6863_s16 + $0x8] ss:$12 sps:$4 sm:$0xff]  }
 0x7f5   : > { %5938 = vrsqrt.f32 %v2779_v31 }
 0x7ff   : > { %v5939_v33 = vpop.eup %5938 }
 0x800   : > { %v2781_v35 = vmul.f32 %v5939_v33, %v2778_v32  ;;  %v5095_v32 = vld [vmem:[%s6864_s23] ss:$0 sm:$0xff]  ;;  %s6865_s23 = sld [smem:[#allocation14_spill]] }
 0x802   : > { %v2788_v37 = vmul.f32 %v5077_v34, %v2781_v35 }
 0x804   : > { %v2795_v38 = vadd.f32 %v5078_v36, %v2788_v37 }
 0x806   : > { %v2796_v39 = vpack.c.bf16 %v2795_v38, %v2795_v38 }
 0x808   : > { %2938 = vmatmul.mubr.bf16.vlgmr.msra.gmra.mrb[28].mxu0 %v2796_v39 }
 0x809   : > { %3383 = vmatprep.mubr.bf16.mxu0 %v6068_v43  ;;  %3352 = vmatpush1.bf16.msra.mxu0 %v5832_v28 }
 0x80a   : > { %3353 = vmatprep.subr.bf16.mxu0 %v5838_v42 }
 0x80d   : > { %3354 = vmatpush1.bf16.msra.mxu0 %v5836_v44 }
 0x8db   : > { %v2939_v60 = vpop.f32.mrb[28].mxu0 }
 0x8dc   : > { %v2940_v61 = vadd.f32 %v2939_v60, %v2818_v58  ;;  %v2941_v63 = vpop.f32.mrb[29].mxu0  ;;  %v5856_v58 = vld [vmem:[%s6863_s16 + $0x90] ss:$12 sps:$4 sm:$0xff]   ;;  %v5862_v60 = vld [vmem:[%s6863_s16 + $0xac] ss:$12 sps:$4 sm:$0xff]  }
 0x8dd   : > { %v2942_v0 = vadd.f32 %v2941_v63, %v2822_v59  ;;  %v2943_v1 = vpop.f32.mrb[30].mxu0  ;;  %v5859_v59 = vld [vmem:[%s6863_s16 + $0x98] ss:$12 sps:$4 sm:$0xff]   ;;  %v5863_v63 = vld [vmem:[%s6863_s16 + $0xb0] ss:$12 sps:$4 sm:$0xff]  }
 0x8de   : > { %v2948_v4 = vmul.f32 0.044715, %v2940_v61  ;;  %v2944_v6 = vpop.f32.mrb[31].mxu0  ;;  %v2946_v18 = vmul.f32 0.5, %v2940_v61 }
 0x8df   : > { %v2949_v8 = vmul.f32 0.044715, %v2942_v0  ;;  %v2947_v20 = vmul.f32 0.5, %v2942_v0 }
 0x8e0   : > { %v2950_v9 = vmul.f32 %v2948_v4, %v2940_v61 }
 0x8e1   : > { %v2951_v10 = vmul.f32 %v2949_v8, %v2942_v0 }
 0x8e2   : > { %v2952_v11 = vmul.f32 %v2950_v9, %v2940_v61 }
 0x8e3   : > { %v2953_v12 = vmul.f32 %v2951_v10, %v2942_v0 }
 0x8e4   : > { %v2954_v13 = vadd.f32 %v2952_v11, %v2940_v61  ;;  %v5860_v61 = vld [vmem:[%s6863_s16 + $0xa8] ss:$12 sps:$4 sm:$0xff]  }
 0x8e5   : > { %v2955_v23 = vadd.f32 %v2953_v12, %v2942_v0 }
 0x8e6   : > { %v2956_v14 = vmul.f32 0.7978846, %v2954_v13  ;;  %v5112_v13 = vld [vmem:[%s6865_s23] ss:$0 sm:$0xff]  ;;  %s6870_s23 = smov 32  }
 0x8e7   : > { %v2957_v15 = vmul.f32 0.7978846, %v2955_v23 }
 0x8e8   : > { %5940 = vtanh.f32 %v2956_v14  ;;  %v5113_v14 = vld [vmem:[%s6866_s2] ss:$0 sm:$0xff]  ;;  %s6868_s2 = smov 96  }
 0x8e9   : > { %5942 = vtanh.f32 %v2957_v15 }
 0x8f2   : > { %v5941_v16 = vpop.eup %5940 }
 0x8f3   : > { %v5943_v17 = vpop.eup %5942  ;;  %v2960_v19 = vadd.f32 1.0, %v5941_v16 }
 0x8f4   : > { %v2961_v22 = vadd.f32 1.0, %v5943_v17 }
 0x8f5   : > { %v2962_v24 = vmul.f32 %v2960_v19, %v2946_v18  ;;  %v3206_v18 = vld [vmem:[%s6867_s3] sm:$0x7]  ;;  %s6869_s3 = smov 64  }
 0x8f6   : > { %v2963_v25 = vmul.f32 %v2961_v22, %v2947_v20  ;;  %v3211_v19 = vrot.slane %v3206_v18, %v6415_v5  ;;  %v3215_v20 = vrot.slane %v3206_v18, %v6411_v3 }
 0x8f7   : > { %v2964_v27 = vpack.c.bf16 %v2962_v24, %v2962_v24 }
 0x8f8   : > { %v2965_v26 = vpack.c.bf16 %v2963_v25, %v2963_v25 }
 0x8fa   : > { %3133 = vmatprep.mubr.bf16.mxu1 %v2965_v26 }
 0x8fb   : > { %3134 = vmatmul.mubr.bf16.vlgmr.msra.gmra.mrb[28].mxu1 %v2964_v27 }
 0x8fc   : > { %5526 = vmatprep.mubr.msk.bf16.mxu1 %vm6069_vm2, %v6067_v62  ;;  %5511 = vmatpush3.bf16.msra.mxu1 %v5835_v30 }
 0x8fd   : > { %5512 = vmatprep.subr.bf16.mxu1 %v6067_v62 }
 0x900   : > { %5513 = vmatpush3.bf16.msra.mxu1 %v5839_v45 }
 0x901   : > { %5514 = vmatprep.subr.bf16.mxu1 %v6067_v62 }
 0x904   : > { %5515 = vmatpush3.bf16.msra.mxu1 %v5843_v47 }
 0x905   : > { %5516 = vmatprep.subr.bf16.mxu1 %v6067_v62 }
 0x908   : > { %5517 = vmatpush3.bf16.msra.mxu1 %v5847_v50 }
 0x909   : > { %5518 = vmatprep.subr.bf16.mxu1 %v6067_v62 }
 0x90c   : > { %5519 = vmatpush3.bf16.msra.mxu1 %v5851_v53 }
 0x90d   : > { %5520 = vmatprep.subr.bf16.mxu1 %v6067_v62 }
 0x910   : > { %5521 = vmatpush3.bf16.msra.mxu1 %v5855_v56 }
 0x911   : > { %5522 = vmatprep.subr.bf16.mxu1 %v6067_v62 }
 0x914   : > { %5523 = vmatpush3.bf16.msra.mxu1 %v5859_v59 }
 0x915   : > { %5524 = vmatprep.subr.bf16.mxu1 %v6067_v62 }
 0x918   : > { %5525 = vmatpush3.bf16.msra.mxu1 %v5863_v63 }
 0x919   : > { %5540 = vmatprep.subr.mxu1 %v6067_v62 }
 0x9ce   : > { %v5344_v31 = vpop.f32.mrb[28].mxu1 }
 0x9cf   : > { %v5345_v33 = vpop.f32.mrb[29].mxu1 }
 0x9d0   : > { %v5346_v34 = vadd.f32 %v5345_v33, %v5344_v31  ;;  %v5347_v35 = vpop.f32.mrb[30].mxu1 }
 0x9d1   : > { %v5348_v36 = vpop.f32.mrb[31].mxu1  ;;  %v3219_v35 = vrot.slane %v3206_v18, %v1628_v21 }
 0x9d2   : > { %v3136_v37 = vadd.f32 %v5346_v34, %v5095_v32 }
 0x9d4   : > { %v6565_v38 = vadd.f32 %v3136_v37, %v6514_v7  ;;  %v5842_v7 = vld [vmem:[%s6863_s16 + $0x34] ss:$12 sps:$4 sm:$0xff]  }
 0x9d5   : > { %3355 = vmatprep.subr.bf16.mxu0 %v5842_v7 }
 0x9d6   : > { %v3144_v39 = vsel %vm1552_vm1, %v6565_v38, 0.0  ;;  %v3148_v40 = vmul.f32 %v6565_v38, %v6565_v38  ;;  %3356 = vmatpush1.bf16.msra.mxu0 %v5840_v46 }
 0x9d7   : > { %3145 = vadd.xlane.f32.xlu0 %v3144_v39  ;;  %3357 = vmatprep.subr.bf16.mxu0 %v5846_v48 }
 0x9d8   : > { %v3149_v41 = vsel %vm1552_vm1, %v3148_v40, 0.0 }
 0x9da   : > { %3358 = vmatpush1.bf16.msra.mxu0 %v5844_v49 }
 0x9db   : > { %3150 = vadd.xlane.f32.xlu0 %v3149_v41  ;;  %3359 = vmatprep.subr.bf16.mxu0 %v5850_v51 }
 0x9de   : > { %3360 = vmatpush1.bf16.msra.mxu0 %v5848_v52 }
 0x9df   : > { %3361 = vmatprep.subr.bf16.mxu0 %v5854_v54 }
 0x9e2   : > { %3362 = vmatpush1.bf16.msra.mxu0 %v5852_v55 }
 0x9e3   : > { %3363 = vmatprep.subr.bf16.mxu0 %v5858_v57 }
 0x9e6   : > { %3364 = vmatpush1.bf16.msra.mxu0 %v5856_v58 }
 0x9e7   : > { %3365 = vmatprep.subr.bf16.mxu0 %v5862_v60 }
 0x9ea   : > { %3366 = vmatpush1.bf16.msra.mxu0 %v5860_v61 }
 0x9eb   : > { %5530 = vmatprep.subr.mxu0 %v6067_v62 }
 0xa64   : > { %v3146_v0 = vpop.xlane.xlu0 %3145 }
 0xa65   : > { %v3147_v1 = vmul.f32 0.0078125, %v3146_v0 }
 0xa67   : > { %v3153_v6 = vmul.f32 %v3147_v1, %v3147_v1  ;;  %v3155_v11 = vsub.f32 %v6565_v38, %v3147_v1 }
 0xa68   : > { %v3151_v4 = vpop.xlane.xlu0 %3150 }
 0xa69   : > { %v3152_v8 = vmul.f32 0.0078125, %v3151_v4 }
 0xa6b   : > { %v3154_v9 = vsub.f32 %v3152_v8, %v3153_v6 }
 0xa6d   : > { %v3156_v10 = vadd.f32 1e-06, %v3154_v9 }
 0xa6f   : > { %5944 = vrsqrt.f32 %v3156_v10 }
 0xa79   : > { %v5945_v12 = vpop.eup %5944 }
 0xa7a   : > { %v3158_v23 = vmul.f32 %v5945_v12, %v3155_v11 }
 0xa7c   : > { %v3165_v15 = vmul.f32 %v5112_v13, %v3158_v23 }
 0xa7e   : > { %v3172_v16 = vadd.f32 %v5113_v14, %v3165_v15 }
 0xa80   : > { %v3173_v17 = vpack.c.bf16 %v3172_v16, %v3172_v16 }
 0xa82   : > { %3384 = vmatmul.mubr.bf16.vlgmr.msra.gmra.mrb[32].mxu0 %v3173_v17  ;;  %5527 = vmatmul.mubr.bf16.vlgmr.msra.gmra.mrb[32].mxu1 %v3173_v17 }
 0xa83   : > { %5532 = vmatprep.mubr.msk.f32.mxu0 %vm6069_vm2, %v6067_v62  ;;  %5542 = vmatprep.mubr.msk.f32.mxu1 %vm6069_vm2, %v6067_v62 }
 0xb55   : > { %v3385_v22 = vpop.f32.mrb[32].mxu0  ;;  %v3426_v24 = vpop.f32.mrb[32].mxu1 }
 0xb56   : > { %v3386_v25 = vadd.f32 %v3385_v22, %v3211_v19  ;;  %v3387_v26 = vpop.f32.mrb[33].mxu0  ;;  %v5528_v27 = vpop.f32.mrb[33].mxu1  ;;  %v6631_v37 = vadd.f32 %v3426_v24, %v3219_v35 }
 0xb57   : > { %v3388_v28 = vadd.f32 %v3387_v26, %v3215_v20  ;;  %v3389_v29 = vpop.f32.mrb[34].mxu0  ;;  %v3429_v30 = vpop.f32.mrb[34].mxu1 }
 0xb58   : > { %v3390_v31 = vpop.f32.mrb[35].mxu0  ;;  %v5529_v32 = vpop.f32.mrb[35].mxu1  ;;  %3433 = vrot.lane.b32.xlu0 %v3386_v25, %s6868_s2 }
 0xb59   : > { %3440 = vrot.lane.b32.xlu1 %v3388_v28, %s6868_s2  ;;  %5531 = vmatpush3.xpose.msk.msra.mxu0 %vm1863_vm3, %v3388_v28 }
 0xb5a   : > { %5535 = vmatprep.subr.mxu0 %v6067_v62 }
 0xb5c   : > { %3435 = vrot.lane.b32.xlu0 %v3386_v25, %s6869_s3  ;;  %5533 = vmatmul.mubr.msk.f32.vlgmr.msra.gmra.mrb[14].mxu0 %vm1863_vm3, %v3386_v25 }
 0xb5d   : > { %3442 = vrot.lane.b32.xlu1 %v3388_v28, %s6869_s3  ;;  %5537 = vmatprep.mubr.msk.f32.mxu0 %vm6069_vm2, %v6067_v62 }
 0xb61   : > { %3444 = vrot.lane.b32.xlu1 %v3388_v28, %s6870_s23 }
 0xb65   : > { %3437 = vrot.lane.b32.xlu1 %v3386_v25, %s6870_s23 }
 0xbca   : > { %v3434_v34 = vpop.permute.xlu0 %3433 }
 0xbcb   : > { %v3441_v33 = vpop.permute.xlu1 %3440 }
 0xbcc   : > { %5536 = vmatpush3.xpose.msk.msra.mxu0 %vm1863_vm3, %v3441_v33 }
 0xbcd   : > { %5545 = vmatprep.subr.mxu0 %v6067_v62 }
 0xbce   : > { %v3436_v39 = vpop.permute.xlu0 %3435 }
 0xbcf   : > { %v3443_v36 = vpop.permute.xlu1 %3442  ;;  %5538 = vmatmul.mubr.msk.f32.vlgmr.msra.gmra.mrb[36].mxu0 %vm1863_vm3, %v3434_v34 }
 0xbd0   : > { %5541 = vmatpush3.xpose.msk.msra.mxu1 %vm1863_vm3, %v3443_v36  ;;  %5547 = vmatprep.mubr.msk.f32.mxu0 %vm6069_vm2, %v6067_v62 }
 0xbd1   : > { %5550 = vmatprep.subr.mxu1 %v6067_v62 }
 0xbd3   : > { %v3445_v40 = vpop.permute.xlu1 %3444  ;;  %5543 = vmatmul.mubr.msk.f32.vlgmr.msra.gmra.mrb[22].mxu1 %vm1863_vm3, %v3436_v39 }
 0xbd4   : > { %5546 = vmatpush3.xpose.msk.msra.mxu0 %vm1863_vm3, %v3445_v40  ;;  %5551 = vmatpush3.msk.msra.mxu1 %vm1552_vm1, %v6631_v37 }
 0xbd5   : > { %5555 = vmatprep.subr.mxu0 %v6067_v62  ;;  %5552 = vmatprep.mubr.msk.f32.mxu1 %vm6069_vm2, %v6067_v62 }
 0xbd6   : > { %5560 = vmatprep.subr.mxu1 %v6067_v62 }
 0xbd7   : > { %v3438_v2 = vpop.permute.xlu1 %3437 }
 0xbd8   : > { %5548 = vmatmul.mubr.msk.f32.vlgmr.msra.gmra.mrb[38].mxu0 %vm1863_vm3, %v3438_v2 }
 0xbd9   : > { %5557 = vmatprep.mubr.msk.f32.mxu0 %vm6069_vm2, %v6067_v62 }
 0xc2f   : > { %v3523_v21 = vpop.f32.mrb[14].mxu0 }
 0xc30   : > { %v3749_v41 = vmul.f32 0.17677669, %v3523_v21  ;;  %v5534_v42 = vpop.f32.mrb[15].mxu0 }
 0xc32   : > { %v3753_v44 = vsel %vm2164_vm4, %v3749_v41, -inf }
 0xc33   : > { %3754 = vmax.xlane.f32.xlu0 %v3753_v44 }
 0xca2   : > { %v3597_v45 = vpop.f32.mrb[36].mxu0 }
 0xca3   : > { %v3750_v7 = vmul.f32 0.17677669, %v3597_v45  ;;  %v5539_v46 = vpop.f32.mrb[37].mxu0 }
 0xca5   : > { %v3756_v47 = vsel %vm2164_vm4, %v3750_v7, -inf }
 0xca6   : > { %v3671_v48 = vpop.f32.mrb[22].mxu1  ;;  %3757 = vmax.xlane.f32.xlu1 %v3756_v47 }
 0xca7   : > { %v3751_v49 = vmul.f32 0.17677669, %v3671_v48  ;;  %v5544_v50 = vpop.f32.mrb[23].mxu1 }
 0xca9   : > { %v3759_v51 = vsel %vm2164_vm4, %v3751_v49, -inf }
 0xcaa   : > { %3760 = vmax.xlane.f32.xlu0 %v3759_v51 }
 0xcab   : > { %v3745_v52 = vpop.f32.mrb[38].mxu0 }
 0xcac   : > { %v3752_v53 = vmul.f32 0.17677669, %v3745_v52  ;;  %v5549_v54 = vpop.f32.mrb[39].mxu0 }
 0xcae   : > { %v3762_v55 = vsel %vm2164_vm4, %v3752_v53, -inf }
 0xcaf   : > { %3763 = vmax.xlane.f32.xlu0 %v3762_v55 }
 0xcb7   : > { %3447 = vrot.lane.b32.xlu1 %v6631_v37, %s6868_s2  ;;  %s6871_s2 = sld [smem:[#allocation18_spill]] }
 0xcbd   : > { %v5864_v30 = vld [vmem:[%s6871_s2] sm:$0xff]   ;;  %v5865_v32 = vld [vmem:[%s6871_s2 + $0x8] sm:$0xff]   ;;  %v5866_v34 = vld [vmem:[%s6871_s2 + $0x10] sm:$0xff]  }
 0xcbe   : > { %v5867_v36 = vld [vmem:[%s6871_s2 + $0x18] sm:$0xff]   ;;  %v5868_v39 = vld [vmem:[%s6871_s2 + $0x20] sm:$0xff]   ;;  %v5869_v21 = vld [vmem:[%s6871_s2 + $0x28] sm:$0xff]  }
 0xcbf   : > { %v5870_v42 = vld [vmem:[%s6871_s2 + $0x30] sm:$0xff]   ;;  %v5871_v46 = vld [vmem:[%s6871_s2 + $0x38] sm:$0xff]   ;;  %s6875_s2 = sld [smem:[#allocation21_spill]] }
 0xcc0   : > { %v3755_v56 = vpop.xlane.xlu0 %3754 }
 0xcc1   : > { %v3765_v57 = vsub.f32 %v3749_v41, %v3755_v56 }
 0xcc3   : > { %v3769_v58 = vmul.f32 1.442695, %v3765_v57 }
 0xcc5   : > { %5946 = vpow2.f32 %v3769_v58 }
 0xccf   : > { %v5947_v59 = vpop.eup %5946 }
 0xcd0   : > { %v3777_v60 = vsel %vm2164_vm4, %v5947_v59, 0.0 }
 0xcdb   : > { %3778 = vadd.xlane.f32.xlu1 %v3777_v60 }
 0xd33   : > { %v3758_v61 = vpop.xlane.xlu1 %3757 }
 0xd34   : > { %v3766_v63 = vsub.f32 %v3750_v7, %v3758_v61 }
 0xd36   : > { %v3771_v0 = vmul.f32 1.442695, %v3766_v63 }
 0xd37   : > { %v3761_v1 = vpop.xlane.xlu0 %3760  ;;  %v3448_v4 = vpop.permute.xlu1 %3447 }
 0xd38   : > { %5948 = vpow2.f32 %v3771_v0  ;;  %v3767_v6 = vsub.f32 %v3751_v49, %v3761_v1  ;;  %5556 = vmatpush3.msk.msra.mxu0 %vm1552_vm1, %v3448_v4 }
 0xd39   : > { %5565 = vmatprep.subr.mxu0 %v6067_v62 }
 0xd3a   : > { %v3773_v8 = vmul.f32 1.442695, %v3767_v6 }
 0xd3c   : > { %5950 = vpow2.f32 %v3773_v8  ;;  %v3764_v9 = vpop.xlane.xlu0 %3763 }
 0xd3d   : > { %v3768_v10 = vsub.f32 %v3752_v53, %v3764_v9 }
 0xd3f   : > { %v3775_v11 = vmul.f32 1.442695, %v3768_v10 }
 0xd41   : > { %5952 = vpow2.f32 %v3775_v11 }
 0xd42   : > { %v5949_v12 = vpop.eup %5948 }
 0xd43   : > { %v3780_v13 = vsel %vm2164_vm4, %v5949_v12, 0.0 }
 0xd44   : > { %3781 = vadd.xlane.f32.xlu0 %v3780_v13 }
 0xd46   : > { %v5951_v23 = vpop.eup %5950 }
 0xd47   : > { %v3783_v14 = vsel %vm2164_vm4, %v5951_v23, 0.0 }
 0xd48   : > { %3784 = vadd.xlane.f32.xlu1 %v3783_v14 }
 0xd4b   : > { %v5953_v15 = vpop.eup %5952 }
 0xd4c   : > { %v3786_v16 = vsel %vm2164_vm4, %v5953_v15, 0.0 }
 0xd4d   : > { %3787 = vadd.xlane.f32.xlu0 %v3786_v16 }
 0xd59   : > { %3451 = vrot.lane.b32.xlu1 %v6631_v37, %s6870_s23  ;;  %s6873_s23 = sld [smem:[#allocation19_spill]] }
 0xd5f   : > { %v5157_v60 = vld [vmem:[%s6873_s23] ss:$0 sm:$0xff]  ;;  %s6874_s23 = sld [smem:[#allocation20_spill]] }
 0xd63   : > { %3449 = vrot.lane.b32.xlu0 %v6631_v37, %s6869_s3  ;;  %s6872_s3 = sld [smem:[#allocation22_spill]] }
 0xd68   : > { %v3779_v17 = vpop.xlane.xlu1 %3778 }
 0xd69   : > { %5954 = vrcp.f32 %v3779_v17  ;;  %v5872_v52 = vld [vmem:[%s6872_s3] ss:$8 sps:$4 sm:$0xff]   ;;  %v5874_v53 = vld [vmem:[%s6872_s3 + $0x4] ss:$8 sps:$4 sm:$0xff]   ;;  %v5877_v54 = vld [vmem:[%s6872_s3 + $0x14] ss:$8 sps:$4 sm:$0xff]  }
 0xd6a   : > { %v5875_v55 = vld [vmem:[%s6872_s3 + $0x10] ss:$8 sps:$4 sm:$0xff]  }
 0xd73   : > { %v5955_v18 = vpop.eup %5954 }
 0xd74   : > { %v3793_v19 = vmul.f32 %v5955_v18, %v5947_v59 }
 0xd76   : > { %5553 = vmatmul.mubr.msk.f32.vlgmr.msra.gmra.mrb[36].mxu1 %vm2209_vm5, %v3793_v19 }
 0xd77   : > { %5562 = vmatprep.mubr.msk.f32.mxu1 %vm6069_vm2, %v6067_v62 }
 0xdd1   : > { %v3782_v20 = vpop.xlane.xlu0 %3781 }
 0xdd2   : > { %5956 = vrcp.f32 %v3782_v20  ;;  %v5880_v20 = vld [vmem:[%s6872_s3 + $0x24] ss:$8 sps:$4 sm:$0xff]  }
 0xdd5   : > { %v3785_v22 = vpop.xlane.xlu1 %3784 }
 0xdd6   : > { %5958 = vrcp.f32 %v3785_v22  ;;  %v5878_v22 = vld [vmem:[%s6872_s3 + $0x20] ss:$8 sps:$4 sm:$0xff]  }
 0xdd9   : > { %v3452_v28 = vpop.permute.xlu1 %3451 }
 0xdda   : > { %v3788_v24 = vpop.xlane.xlu0 %3787 }
 0xddb   : > { %5960 = vrcp.f32 %v3788_v24  ;;  %v5881_v24 = vld [vmem:[%s6872_s3 + $0x30] ss:$8 sps:$4 sm:$0xff]  }
 0xddc   : > { %v5957_v25 = vpop.eup %5956 }
 0xddd   : > { %v3794_v26 = vmul.f32 %v5957_v25, %v5949_v12  ;;  %v5886_v25 = vld [vmem:[%s6872_s3 + $0x44] ss:$8 sps:$4 sm:$0xff]  }
 0xdde   : > { %v3450_v27 = vpop.permute.xlu0 %3449 }
 0xddf   : > { %5558 = vmatmul.mubr.msk.f32.vlgmr.msra.gmra.mrb[40].mxu0 %vm2209_vm5, %v3794_v26  ;;  %5561 = vmatpush3.msk.msra.mxu1 %vm1552_vm1, %v3450_v27  ;;  %v5884_v26 = vld [vmem:[%s6872_s3 + $0x40] ss:$8 sps:$4 sm:$0xff]   ;;  %v5889_v27 = vld [vmem:[%s6872_s3 + $0x54] ss:$8 sps:$4 sm:$0xff]  }
 0xde0   : > { %v5959_v29 = vpop.eup %5958  ;;  %5566 = vmatpush3.msk.msra.mxu0 %vm1552_vm1, %v3452_v28  ;;  %5567 = vmatprep.mubr.msk.f32.mxu0 %vm6069_vm2, %v6067_v62  ;;  %v5887_v28 = vld [vmem:[%s6872_s3 + $0x50] ss:$8 sps:$4 sm:$0xff]  }
 0xde1   : > { %v3795_v31 = vmul.f32 %v5959_v29, %v5951_v23  ;;  %5570 = vmatprep.subr.bf16.mxu1 %v6067_v62  ;;  %5578 = vmatprep.subr.bf16.mxu0 %v6067_v62  ;;  %v5892_v29 = vld [vmem:[%s6872_s3 + $0x64] ss:$8 sps:$4 sm:$0xff]  }
 0xde3   : > { %5563 = vmatmul.mubr.msk.f32.vlgmr.msra.gmra.mrb[38].mxu1 %vm2209_vm5, %v3795_v31  ;;  %v5895_v31 = vld [vmem:[%s6872_s3 + $0x74] ss:$8 sps:$4 sm:$0xff]  }
 0xde4   : > { %5571 = vmatpush3.bf16.msra.mxu1 %v5864_v30  ;;  %5574 = vmatprep.mubr.msk.bf16.mxu1 %vm6069_vm2, %v6067_v62  ;;  %v5890_v30 = vld [vmem:[%s6872_s3 + $0x60] ss:$8 sps:$4 sm:$0xff]  }
 0xde5   : > { %v5961_v33 = vpop.eup %5960  ;;  %5572 = vmatprep.subr.bf16.mxu1 %v6067_v62 }
 0xde6   : > { %v3796_v35 = vmul.f32 %v5961_v33, %v5953_v15 }
 0xde8   : > { %5568 = vmatmul.mubr.msk.f32.vlgmr.msra.gmra.mrb[42].mxu0 %vm2209_vm5, %v3796_v35  ;;  %5573 = vmatpush3.bf16.msra.mxu1 %v5865_v32  ;;  %v5893_v32 = vld [vmem:[%s6872_s3 + $0x70] ss:$8 sps:$4 sm:$0xff]  }
 0xde9   : > { %5579 = vmatpush3.bf16.msra.mxu0 %v5866_v34  ;;  %5586 = vmatprep.subr.bf16.mxu1 %v6067_v62 }
 0xdea   : > { %5580 = vmatprep.subr.bf16.mxu0 %v6067_v62  ;;  %5582 = vmatprep.mubr.msk.bf16.mxu0 %vm6069_vm2, %v6067_v62 }
 0xded   : > { %5581 = vmatpush3.bf16.msra.mxu0 %v5867_v36 }
 0xdee   : > { %5594 = vmatprep.subr.bf16.mxu0 %v6067_v62 }
 0xe49   : > { %v3868_v37 = vpop.f32.mrb[36].mxu1 }
 0xe4a   : > { %v4098_v40 = vpack.c.bf16 %v3868_v37, %v3868_v37  ;;  %v5554_v2 = vpop.f32.mrb[37].mxu1 }
 0xe4c   : > { %5575 = vmatmul.mubr.msk.bf16.vlgmr.msra.gmra.mrb[40].mxu1 %vm1863_vm3, %v4098_v40 }
 0xe4d   : > { %5587 = vmatpush3.bf16.msra.mxu1 %v5868_v39  ;;  %5590 = vmatprep.mubr.msk.bf16.mxu1 %vm6069_vm2, %v6067_v62 }
 0xe4e   : > { %5588 = vmatprep.subr.bf16.mxu1 %v6067_v62 }
 0xe51   : > { %5589 = vmatpush3.bf16.msra.mxu1 %v5869_v21 }
 0xe52   : > { %4492 = vmatprep.subr.bf16.mxu1 %v5874_v53  ;;  %v5902_v53 = vld [vmem:[%s6876_s5 + $0x58] sm:$0xff]  }
 0xeb2   : > { %v3943_v41 = vpop.f32.mrb[40].mxu0 }
 0xeb3   : > { %v4165_v44 = vpack.c.bf16 %v3943_v41, %v3943_v41  ;;  %v5559_v45 = vpop.f32.mrb[41].mxu0  ;;  %v5179_v41 = vld [vmem:[%s6874_s23] ss:$0 sm:$0xff]  ;;  %s6878_s23 = sld [smem:[#allocation25_spill]] }
 0xeb5   : > { %5583 = vmatmul.mubr.msk.bf16.vlgmr.msra.gmra.mrb[44].mxu0 %vm1863_vm3, %v4165_v44  ;;  %v5180_v44 = vld [vmem:[%s6875_s2] ss:$0 sm:$0xff]  ;;  %s6877_s2 = sld [smem:[#allocation23_spill]] }
 0xeb6   : > { %v4018_v7 = vpop.f32.mrb[38].mxu1  ;;  %5595 = vmatpush3.bf16.msra.mxu0 %v5870_v42  ;;  %5598 = vmatprep.mubr.msk.bf16.mxu0 %vm6069_vm2, %v6067_v62 }
 0xeb7   : > { %v4227_v47 = vpack.c.bf16 %v4018_v7, %v4018_v7  ;;  %v5564_v48 = vpop.f32.mrb[39].mxu1  ;;  %5596 = vmatprep.subr.bf16.mxu0 %v6067_v62 }
 0xeb8   : > { %v5897_v48 = vld [vmem:[%s6876_s5] sm:$0xff]  }
 0xeb9   : > { %5591 = vmatmul.mubr.msk.bf16.vlgmr.msra.gmra.mrb[44].mxu1 %vm1863_vm3, %v4227_v47  ;;  %v5896_v47 = vld [vmem:[%s6876_s5 + $0x40] sm:$0xff]  }
 0xeba   : > { %5597 = vmatpush3.bf16.msra.mxu0 %v5871_v46  ;;  %4524 = vmatprep.mubr.bf16.mxu1 %v6068_v43 }
 0xebb   : > { %v4093_v49 = vpop.f32.mrb[42].mxu0  ;;  %4493 = vmatpush1.bf16.msra.mxu1 %v5872_v52  ;;  %5387 = vmatprep.subr.bf16.mxu0 %v5896_v47  ;;  %v5901_v52 = vld [vmem:[%s6876_s5 + $0x10] sm:$0xff]   ;;  %v5919_v47 = vld [vmem:[%s6237_s20 + $0x38] sm:$0xff]  }
 0xebc   : > { %v4289_v50 = vpack.c.bf16 %v4093_v49, %v4093_v49  ;;  %v5569_v51 = vpop.f32.mrb[43].mxu0  ;;  %4494 = vmatprep.subr.bf16.mxu1 %v5877_v54  ;;  %v5898_v49 = vld [vmem:[%s6876_s5 + $0x48] sm:$0xff]   ;;  %v5903_v54 = vld [vmem:[%s6876_s5 + $0x18] sm:$0xff]  }
 0xebd   : > { %v5900_v51 = vld [vmem:[%s6876_s5 + $0x50] sm:$0xff]  }
 0xebe   : > { %5599 = vmatmul.mubr.msk.bf16.vlgmr.msra.gmra.mrb[48].mxu0 %vm1863_vm3, %v4289_v50  ;;  %v5899_v50 = vld [vmem:[%s6876_s5 + $0x8] sm:$0xff]  }
 0xebf   : > { %4495 = vmatpush1.bf16.msra.mxu1 %v5875_v55  ;;  %5388 = vmatpush3.bf16.msra.mxu0 %v5897_v48  ;;  %v5904_v55 = vld [vmem:[%s6876_s5 + $0x60] sm:$0xff]  }
 0xec0   : > { %4496 = vmatprep.subr.bf16.mxu1 %v5880_v20  ;;  %5389 = vmatprep.subr.bf16.mxu0 %v5898_v49 }
 0xec3   : > { %4497 = vmatpush1.bf16.msra.mxu1 %v5878_v22  ;;  %5390 = vmatpush3.bf16.msra.mxu0 %v5899_v50 }
 0xec4   : > { %5391 = vmatprep.subr.bf16.mxu0 %v5900_v51 }
 0xec7   : > { %5392 = vmatpush3.bf16.msra.mxu0 %v5901_v52 }
 0xec8   : > { %5393 = vmatprep.subr.bf16.mxu0 %v5902_v53 }
 0xecb   : > { %5394 = vmatpush3.bf16.msra.mxu0 %v5903_v54 }
 0xecc   : > { %5395 = vmatprep.subr.bf16.mxu0 %v5904_v55 }
 0xf1f   : > { %v4152_v56 = vpop.f32.mrb[40].mxu1 }
 0xf20   : > { %v5576_v57 = vpop.f32.mrb[41].mxu1  ;;  %v4164_v43 = vadd.f32 %v5157_v60, %v4152_v56  ;;  %v5905_v56 = vld [vmem:[%s6876_s5 + $0x20] sm:$0xff]   ;;  %v5909_v60 = vld [vmem:[%s6876_s5 + $0x30] sm:$0xff]  }
 0xf21   : > { %v4155_v58 = vpop.f32.mrb[42].mxu1  ;;  %v5906_v57 = vld [vmem:[%s6876_s5 + $0x68] sm:$0xff]   ;;  %5396 = vmatpush3.bf16.msra.mxu0 %v5905_v56 }
 0xf22   : > { %v5577_v59 = vpop.f32.mrb[43].mxu1  ;;  %v5907_v58 = vld [vmem:[%s6876_s5 + $0x28] sm:$0xff]   ;;  %5397 = vmatprep.subr.bf16.mxu0 %v5906_v57 }
 0xf23   : > { %v5908_v59 = vld [vmem:[%s6876_s5 + $0x70] sm:$0xff]  }
 0xf25   : > { %5398 = vmatpush3.bf16.msra.mxu0 %v5907_v58 }
 0xf26   : > { %5399 = vmatprep.subr.bf16.mxu0 %v5908_v59  ;;  %v4730_v59 = vld [vmem:[%s6880_s12] sm:$0x1] }
 0xf29   : > { %5400 = vmatpush3.bf16.msra.mxu0 %v5909_v60 }
 0xf88   : > { %v4220_v61 = vpop.f32.mrb[44].mxu0 }
 0xf89   : > { %v4226_v63 = vadd.f32 %v4220_v61, %v4164_v43  ;;  %v5584_v0 = vpop.f32.mrb[45].mxu0  ;;  %v5910_v43 = vld [vmem:[%s6876_s5 + $0x78] sm:$0xff]  }
 0xf8a   : > { %v4223_v1 = vpop.f32.mrb[46].mxu0  ;;  %v5911_v61 = vld [vmem:[%s6876_s5 + $0x38] sm:$0xff]   ;;  %5401 = vmatprep.subr.bf16.mxu0 %v5910_v43 }
 0xf8b   : > { %v5585_v4 = vpop.f32.mrb[47].mxu0  ;;  %5402 = vmatpush3.bf16.msra.mxu0 %v5911_v61  ;;  %v4765_v61 = vld [vmem:[%s6242_s27] sm:$0x1] }
 0xf8c   : > { %v4282_v6 = vpop.f32.mrb[44].mxu1 }
 0xf8d   : > { %v4288_v8 = vadd.f32 %v4282_v6, %v4226_v63  ;;  %v5592_v9 = vpop.f32.mrb[45].mxu1  ;;  %v4400_v63 = vld [vmem:[%s6877_s2] sm:$0x3]  ;;  %s6879_s2 = sld [smem:[#allocation26_spill]] }
 0xf8e   : > { %v4285_v10 = vpop.f32.mrb[46].mxu1  ;;  %v4405_v0 = vrot.slane %v4400_v63, %v6415_v5  ;;  %v4409_v1 = vrot.slane %v4400_v63, %v6411_v3 }
 0xf8f   : > { %v5593_v11 = vpop.f32.mrb[47].mxu1 }
 0xf91   : > { %v4344_v12 = vpop.f32.mrb[48].mxu0 }
 0xf92   : > { %v4350_v13 = vadd.f32 %v4344_v12, %v4288_v8  ;;  %v5600_v23 = vpop.f32.mrb[49].mxu0 }
 0xf93   : > { %v4347_v14 = vpop.f32.mrb[50].mxu0  ;;  %v4729_v57 = vld [vmem:[%s6879_s2] sm:$0x1] }
 0xf94   : > { %v6705_v15 = vadd.f32 %v4350_v13, %v6565_v38  ;;  %v5601_v16 = vpop.f32.mrb[51].mxu0  ;;  %v5883_v38 = vld [vmem:[%s6872_s3 + $0x34] ss:$8 sps:$4 sm:$0xff]   ;;  %s5222_s3 = sshll.u32 %s6270_s0, 4  ;;  %s6073_s0 = smov [#allocation2]  }
 0xf95   : > { %4498 = vmatprep.subr.bf16.mxu1 %v5883_v38  ;;  %s6774_s8 = scalar_lea.hbm %s6247_s4, %s5222_s3  ;;  %s5974_s12 = sshll.u32 %s6073_s0, 4  ;;  %s5975_s12 = int_to_ptr.vmem [resolvable:$false] %s5974_s12 }
 0xf96   : > { %v4354_v17 = vsel %vm1552_vm1, %v6705_v15, 0.0  ;;  %v4358_v18 = vmul.f32 %v6705_v15, %v6705_v15  ;;  %4499 = vmatpush1.bf16.msra.mxu1 %v5881_v24  ;;  %s5976_s13 = scalar_lea.vmem %s5975_s12, 32 }
 0xf97   : > { %4355 = vadd.xlane.f32.xlu1 %v4354_v17  ;;  %4500 = vmatprep.subr.bf16.mxu1 %v5886_v25 }
 0xf98   : > { %v4359_v19 = vsel %vm1552_vm1, %v4358_v18, 0.0 }
 0xf99   : > { %4360 = vadd.xlane.f32.xlu0 %v4359_v19 }
 0xf9a   : > { %4501 = vmatpush1.bf16.msra.mxu1 %v5884_v26 }
 0xf9b   : > { %4502 = vmatprep.subr.bf16.mxu1 %v5889_v27 }
 0xf9e   : > { %4503 = vmatpush1.bf16.msra.mxu1 %v5887_v28 }
 0xf9f   : > { %4504 = vmatprep.subr.bf16.mxu1 %v5892_v29 }
 0xfa2   : > { %4505 = vmatpush1.bf16.msra.mxu1 %v5890_v30 }
 0xfa3   : > { %4506 = vmatprep.subr.bf16.mxu1 %v5895_v31  ;;  %v5912_v31 = vld [vmem:[%s6237_s20] sm:$0xff]  }
 0xfa6   : > { %4507 = vmatpush1.bf16.msra.mxu1 %v5893_v32 }
 0xfa7   : > { %5602 = vmatprep.subr.bf16.mxu1 %v6067_v62 }
0x1024   : > { %v4356_v33 = vpop.xlane.xlu1 %4355 }
0x1025   : > { %v4357_v34 = vmul.f32 0.0078125, %v4356_v33  ;;  %v5197_v33 = vld [vmem:[%s6878_s23] ss:$0 sm:$0xff]  ;;  %s1005_s23 = sand.u32 1, %s6024_s10  }
0x1026   : > { %v4361_v35 = vpop.xlane.xlu0 %4360  ;;  %s1006_s5 = scalar_lea.vmem [#allocation2], %s1005_s23  ;;  %s4856_s2 = scalar_lea.sflag [#allocation3], %s1005_s23 }
0x1027   : > { %v4363_v36 = vmul.f32 %v4357_v34, %v4357_v34  ;;  %v4362_v37 = vmul.f32 0.0078125, %v4361_v35  ;;  %v4365_v2 = vsub.f32 %v6705_v15, %v4357_v34  ;;  %s4868_s6 = sshll.u32 %s1006_s5, 4  ;;  %s6776_s6 = int_to_ptr.vmem [resolvable:$true] %s4868_s6 }
0x1028   : > { %s5970_s9 = scalar_lea.vmem %s6776_s6, 16  ;;  %p5977_p0 = scmp.lt.s32.totalorder %s6776_s6, %s5975_s12 }
0x1029   : > { %v4364_v39 = vsub.f32 %v4362_v37, %v4363_v36  ;;  %p5971_p11 = scmp.ne.s32.totalorder %s6776_s6, %s5970_s9  ;;  %p5978_p1 = scmp.lt.s32.totalorder %s5976_s13, %s5970_s9 }
0x102b   : > { %v4366_v40 = vadd.f32 1e-06, %v4364_v39  ;;  %p5972_p12 = pnand %p5971_p11, %p6287_p5  ;;  %p5979_p2 = por %p5978_p1, %p5977_p0 }
0x102d   : > { %5962 = vrsqrt.f32 %v4366_v40  ;;  %p5973_p13 = pneg %p5972_p12 }
0x102f   : > { %p5980_p3 = pnand %p5979_p2, %p5973_p13 }
0x1037   : > { %v5963_v21 = vpop.eup %5962 }
0x1038   : > { %v4368_v42 = vmul.f32 %v5963_v21, %v4365_v2 }
0x103a   : > { %v4375_v45 = vmul.f32 %v5179_v41, %v4368_v42  ;;  %v5913_v42 = vld [vmem:[%s6237_s20 + $0x8] sm:$0xff]  }
0x103c   : > { %v4382_v7 = vadd.f32 %v5180_v44, %v4375_v45  ;;  %v5914_v44 = vld [vmem:[%s6237_s20 + $0x10] sm:$0xff]   ;;  %v5915_v45 = vld [vmem:[%s6237_s20 + $0x18] sm:$0xff]  }
0x103e   : > { %v4383_v46 = vpack.c.bf16 %v4382_v7, %v4382_v7  ;;  %v5917_v7 = vld [vmem:[%s6237_s20 + $0x28] sm:$0xff]  }
0x1040   : > { %4525 = vmatmul.mubr.bf16.vlgmr.msra.gmra.mrb[48].mxu1 %v4383_v46  ;;  %v5918_v46 = vld [vmem:[%s6237_s20 + $0x30] sm:$0xff]  }
0x1041   : > { %5618 = vmatprep.mubr.msk.bf16.mxu1 %vm6069_vm2, %v6067_v62  ;;  %5603 = vmatpush3.bf16.msra.mxu1 %v5912_v31 }
0x1042   : > { %5604 = vmatprep.subr.bf16.mxu1 %v6067_v62 }
0x1045   : > { %5605 = vmatpush3.bf16.msra.mxu1 %v5913_v42 }
0x1046   : > { %5606 = vmatprep.subr.bf16.mxu1 %v6067_v62 }
0x1049   : > { %5607 = vmatpush3.bf16.msra.mxu1 %v5914_v44 }
0x104a   : > { %5608 = vmatprep.subr.bf16.mxu1 %v6067_v62 }
0x104d   : > { %5609 = vmatpush3.bf16.msra.mxu1 %v5915_v45 }
0x104e   : > { %5610 = vmatprep.subr.bf16.mxu1 %v6067_v62 }
0x1113   : > { %v4526_v4 = vpop.f32.mrb[48].mxu1 }
0x1114   : > { %v4527_v6 = vadd.f32 %v4526_v4, %v4405_v0  ;;  %v4528_v8 = vpop.f32.mrb[49].mxu1 }
0x1115   : > { %v4529_v9 = vadd.f32 %v4528_v8, %v4409_v1  ;;  %v4530_v10 = vpop.f32.mrb[50].mxu1 }
0x1116   : > { %v4535_v11 = vmul.f32 0.044715, %v4527_v6  ;;  %v4531_v12 = vpop.f32.mrb[51].mxu1  ;;  %v4533_v38 = vmul.f32 0.5, %v4527_v6 }
0x1117   : > { %v4536_v13 = vmul.f32 0.044715, %v4529_v9  ;;  %v4534_v25 = vmul.f32 0.5, %v4529_v9 }
0x1118   : > { %v4537_v23 = vmul.f32 %v4535_v11, %v4527_v6 }
0x1119   : > { %v4538_v14 = vmul.f32 %v4536_v13, %v4529_v9 }
0x111a   : > { %v4539_v16 = vmul.f32 %v4537_v23, %v4527_v6 }
0x111b   : > { %v4540_v17 = vmul.f32 %v4538_v14, %v4529_v9 }
0x111c   : > { %v4541_v18 = vadd.f32 %v4539_v16, %v4527_v6 }
0x111d   : > { %v4542_v19 = vadd.f32 %v4540_v17, %v4529_v9 }
0x111e   : > { %v4543_v20 = vmul.f32 0.7978846, %v4541_v18 }
0x111f   : > { %v4544_v22 = vmul.f32 0.7978846, %v4542_v19 }
0x1120   : > { %5964 = vtanh.f32 %v4543_v20 }
0x1121   : > { %5966 = vtanh.f32 %v4544_v22 }
0x112a   : > { %v5965_v3 = vpop.eup %5964 }
0x112b   : > { %v5967_v5 = vpop.eup %5966  ;;  %v4547_v24 = vadd.f32 1.0, %v5965_v3 }
0x112c   : > { %v4548_v26 = vadd.f32 1.0, %v5967_v5 }
0x112d   : > { %v4549_v27 = vmul.f32 %v4547_v24, %v4533_v38 }
0x112e   : > { %v4550_v28 = vmul.f32 %v4548_v26, %v4534_v25 }
0x112f   : > { %v4551_v30 = vpack.c.bf16 %v4549_v27, %v4549_v27 }
0x1130   : > { %v4552_v29 = vpack.c.bf16 %v4550_v28, %v4550_v28 }
0x1132   : > { %4720 = vmatprep.mubr.bf16.mxu0 %v4552_v29 }
0x1133   : > { %4721 = vmatmul.mubr.bf16.vlgmr.msra.gmra.mrb[52].mxu0 %v4551_v30 }
0x1206   : > { %v5403_v32 = vpop.f32.mrb[52].mxu0 }
0x1207   : > { %v5404_v34 = vpop.f32.mrb[53].mxu0 }
0x1208   : > { %v5405_v35 = vadd.f32 %v5404_v34, %v5403_v32  ;;  %v5406_v36 = vpop.f32.mrb[54].mxu0 }
0x1209   : > { %v5407_v37 = vpop.f32.mrb[55].mxu0 }
0x120a   : > { %v4723_v39 = vadd.f32 %v5405_v35, %v5197_v33 }
0x120c   : > { %v4728_v40 = vadd.f32 %v4723_v39, %v6705_v15  ;;  %v5916_v15 = vld [vmem:[%s6237_s20 + $0x20] sm:$0xff]  }
0x120d   : > { %5611 = vmatpush3.bf16.msra.mxu1 %v5916_v15 }
0x120e   : > { %v4731_v2 = vsel %vm1546_vm0, %v4728_v40, 0.0  ;;  %v4735_v21 = vmul.f32 %v4728_v40, %v4728_v40  ;;  %5612 = vmatprep.subr.bf16.mxu1 %v6067_v62 }
0x120f   : > { %4732 = vadd.xlane.f32.xlu0 %v4731_v2 }
0x1210   : > { %v4736_v41 = vsel %vm1546_vm0, %v4735_v21, 0.0 }
0x1211   : > { %4737 = vadd.xlane.f32.xlu1 %v4736_v41  ;;  %5613 = vmatpush3.bf16.msra.mxu1 %v5917_v7 }
0x1212   : > { %5614 = vmatprep.subr.bf16.mxu1 %v6067_v62 }
0x1215   : > { %5615 = vmatpush3.bf16.msra.mxu1 %v5918_v46 }
0x1216   : > { %5616 = vmatprep.subr.bf16.mxu1 %v6067_v62 }
0x1219   : > { %5617 = vmatpush3.bf16.msra.mxu1 %v5919_v47 }
0x129c   : > { %v4733_v48 = vpop.xlane.xlu0 %4732 }
0x129d   : > { %v4734_v49 = vmul.f32 0.0078125, %v4733_v48 }
0x129e   : > { %v4738_v50 = vpop.xlane.xlu1 %4737 }
0x129f   : > { %v4740_v51 = vmul.f32 %v4734_v49, %v4734_v49  ;;  %v4739_v52 = vmul.f32 0.0078125, %v4738_v50  ;;  %v4742_v55 = vsub.f32 %v4728_v40, %v4734_v49 }
0x12a1   : > { %v4741_v53 = vsub.f32 %v4739_v52, %v4740_v51 }
0x12a3   : > { %v4743_v54 = vadd.f32 1e-06, %v4741_v53 }
0x12a5   : > { %5968 = vrsqrt.f32 %v4743_v54 }
0x12af   : > { %v5969_v56 = vpop.eup %5968 }
0x12b0   : > { %v4745_v58 = vmul.f32 %v5969_v56, %v4742_v55 }
0x12b2   : > { %v4746_v60 = vmul.f32 %v4745_v58, %v4729_v57 }
0x12b4   : > { %v4747_v62 = vadd.f32 %v4746_v60, %v4730_v59 }
0x12b6   : > { %v4748_v43 = vpack.c.bf16 %v4747_v62, %v4747_v62 }
0x12b8   : > { %5619 = vmatmul.mubr.bf16.vlgmr.msra.gmra.mrb[52].mxu1 %v4748_v43 }
0x138b   : > { %v4848_v63 = vpop.f32.mrb[52].mxu1 }
0x138c   : > { %v4849_v0 = vadd.f32 %v4848_v63, %v4765_v61  ;;  %v5620_v1 = vpop.f32.mrb[53].mxu1 }
0x138d   : > { %v4851_v4 = vpop.f32.mrb[54].mxu1 }
0x138e   : > { %4854 = vst [vmem:[%s1006_s5] sm:$0x1] %v4849_v0  ;;  %v5621_v6 = vpop.f32.mrb[55].mxu1 }
0x138f   : > { %5983 = shalt.err (!%p5980_p3)
}
0x1390   : > { %s5984_s5 = scalar_lea.hbm %s6774_s8, 16  ;;  %s5988_s3 = scalar_lea.hbm %s6247_s4, 32 }
0x1391   : > { %p5985_p4 = scmp.ne.s32.totalorder %s6774_s8, %s5984_s5  ;;  %p5989_p9 = scmp.lt.u32.totalorder %s6774_s8, %s6247_s4 }
0x1392   : > { %p5990_p10 = scmp.lt.u32.totalorder %s5988_s3, %s5984_s5  ;;  %p5992_p12 = scmp.lt.u32.totalorder %s5984_s5, %s6774_s8 }
0x1393   : > { %p5986_p7 = pnand %p5985_p4, %p6287_p5 }
0x1394   : > { %p5991_p11 = por %p5990_p10, %p5989_p9 }
0x1395   : > { %p5987_p8 = pneg %p5986_p7 }
0x1396   : > { %p5993_p0 = por %p5992_p12, %p5991_p11 }
0x1398   : > { %p5994_p13 = pnand %p5993_p0, %p5987_p8 }
0x139a   : > { %5997 = shalt.err (!%p5994_p13)
}
0x139b   : > { %5623 = dma.vmem_to_hbm [thread:$0]  (%p6287_p5), %s6776_s6, 16, %s6774_s8, %s4856_s2  }
0x139c PF: > { %p5629_p1 = scmp.ge.s32.totalorder %s6032_s15, 2  ;;  %s4880_s9 = sand.u32 1, %s6020_s7  }
0x139d   : > { %s4881_s13 = scalar_lea.sflag [#allocation3], %s4880_s9 }
0x139e   : > { %p5626_p2 = pnand %p5629_p1, %p6291_p6 }
0x13a0   : > { %6015 = dma.done.wait (!%p5626_p2), %s4881_s13, 16  }
0x13a1   : > { %6017 = vsyncadd (!%p5626_p2), %s4881_s13, 4294967280  ;;  %p77_p3 = scmp.ge.s32.totalorder %s6274_s18, 4   ;;  %s6881_s7 = smov %s6024_s10 }
0x13a2   : > { %s6882_s10 = smov %s6028_s11  ;;  %s6883_s11 = smov %s6285_s26 }
0x13a3   : > { %s6884_s15 = smov %s6274_s18  ;;  %79 = sbr.rel (!%p77_p3) target bundleno = 70 (0x46), region = 226 }
0x13aa   :  { %4885 = vsyncpa [#allocation3], 1 }
0x13ab   :  { %4887 = vsyncpa [#allocation3 + $0x1], 1 }

</bundles_post_ra>
